<compile_context>
chip_gen: v7x
topology: tpu7x:2x2x1
jax: 0.10.0
libtpu: 0.0.40
codegen_flags: <defaults>
</compile_context>

<pallas_src>
from functools import partial

import jax
import jax.numpy as jnp
from jax import lax
from jax.experimental import pallas as pl
from jax.experimental.pallas import tpu as pltpu

HP = 128   # padded hidden size = one full lane width
AP = 128   # padded action dim  = one full lane width (lane-dense y store)


# ----------------------------- Pallas kernel ------------------------------ #
def qnet_kernel(x_ref, h0_ref, c0_ref,
                w1_ref, b1_ref,
                wih_ref, whh_ref, b_lstm_ref,
                w2_ref, b2_ref,
                y_ref, h_out_ref, c_out_ref,
                gx_ref, hseq_ref):
    TB = x_ref.shape[0]
    B, Hp = h0_ref.shape
    T = TB // B

    # ---- batched input-side work for ALL timesteps (off the serial path) --
    # Linear1 + ReLU in f32; operands are bf16 for the MXU.
    z = jnp.maximum(
        jnp.dot(x_ref[...], w1_ref[...], preferred_element_type=jnp.float32)
        + b1_ref[...], 0.0)                                    # (T*B, Hp) f32
    # z @ W_ih + (b_ih + b_hh): spilled to VMEM scratch, not kept live.
    gx_ref[...] = (jnp.dot(z.astype(jnp.bfloat16), wih_ref[...],
                           preferred_element_type=jnp.float32)
                   + b_lstm_ref[...])                          # (T*B, 4Hp) f32

    # ---- serial recurrence: only h @ W_hh + elementwise per step ----------
    # TODO(synk): hold W_hh MXU-resident across steps with
    # pltpu.matmul_push_rhs / matmul_acc_lhs / matmul_pop for a shorter
    # per-step critical path; the jnp.dot form below keeps it streamed from
    # VMEM (no 32-vreg live value across the unrolled loop).
    h = h0_ref[...]                                            # (B, Hp) f32
    c = c0_ref[...]                                            # (B, Hp) f32
    for t in range(T):
        gates = (gx_ref[t * B:(t + 1) * B, :]
                 + jnp.dot(h.astype(jnp.bfloat16), whh_ref[...],
                           preferred_element_type=jnp.float32))  # (B, 4Hp) f32
        # padded gate layout is (i, f, o, g): one sigmoid over a contiguous
        # 3*Hp slab, one tanh.
        sg = jax.nn.sigmoid(gates[:, 0:3 * Hp])
        i_g = sg[:, 0 * Hp:1 * Hp]
        f_g = sg[:, 1 * Hp:2 * Hp]
        o_g = sg[:, 2 * Hp:3 * Hp]
        g_g = jnp.tanh(gates[:, 3 * Hp:4 * Hp])
        c = f_g * c + i_g * g_g
        h = o_g * jnp.tanh(c)
        hseq_ref[t * B:(t + 1) * B, :] = h

    h_out_ref[...] = h
    c_out_ref[...] = c

    # ---- batched Linear2 over all timesteps, one lane-dense 128-wide store -
    y_ref[...] = (jnp.dot(hseq_ref[...].astype(jnp.bfloat16), w2_ref[...],
                          preferred_element_type=jnp.float32)
                  + b2_ref[...])                               # (T*B, AP) f32


# --------------------------- parameter padding ----------------------------- #
def pad_params(params, H, Hp=HP, Ap=AP):
    """Zero-pad H -> Hp (=128) and A -> Ap (=128); repack gates (i,f,g,o) ->
    (i,f,o,g); cast matmul operands to bf16. Run ONCE at init, not per call."""
    w1, b1, wih, whh, b_lstm, w2, b2 = params
    S = w1.shape[0]
    A = w2.shape[1]

    w1_p = jnp.zeros((S, Hp), jnp.float32).at[:, :H].set(w1)
    b1_p = jnp.zeros((1, Hp), jnp.float32).at[:, :H].set(b1)

    wih_p = jnp.zeros((Hp, 4 * Hp), jnp.float32)
    whh_p = jnp.zeros((Hp, 4 * Hp), jnp.float32)
    b_lstm_p = jnp.zeros((1, 4 * Hp), jnp.float32)
    # PyTorch gate order in the weights is (i, f, g, o); destination order is
    # (i, f, o, g) so the kernel can sigmoid one contiguous 3*Hp slab.
    for dst, src in enumerate((0, 1, 3, 2)):
        wih_p = wih_p.at[:H, dst * Hp:dst * Hp + H].set(
            wih[:, src * H:(src + 1) * H])
        whh_p = whh_p.at[:H, dst * Hp:dst * Hp + H].set(
            whh[:, src * H:(src + 1) * H])
        b_lstm_p = b_lstm_p.at[:, dst * Hp:dst * Hp + H].set(
            b_lstm[:, src * H:(src + 1) * H])

    w2_p = jnp.zeros((Hp, Ap), jnp.float32).at[:H, :A].set(w2)
    b2_p = jnp.zeros((1, Ap), jnp.float32).at[:, :A].set(b2)

    # bf16 for matmul operands; biases stay f32 (added to f32 MXU results).
    return (w1_p.astype(jnp.bfloat16), b1_p,
            wih_p.astype(jnp.bfloat16), whh_p.astype(jnp.bfloat16), b_lstm_p,
            w2_p.astype(jnp.bfloat16), b2_p)


# ------------------------------ JAX wrapper -------------------------------- #
@partial(jax.jit, static_argnames=("action_space",))
def qnet_forward(x, h, c, padded_params, *, action_space):
    """x: (B, T, S) batch_first. h, c: (1, B, H). Returns (y, new_h, new_c)."""
    w1_p, b1_p, wih_p, whh_p, b_lstm_p, w2_p, b2_p = padded_params
    B, T, S = x.shape
    H = h.shape[-1]
    A = action_space

    # All layout work (transpose, flatten, dtype cast, state padding) lives in
    # the wrapper so the kernel only sees flat lane-aligned slabs.
    x_flat = jnp.transpose(x, (1, 0, 2)).reshape(T * B, S).astype(jnp.bfloat16)
    # Zero-fill of padded lanes is MANDATORY for the padded-lane invariant.
    h0 = jnp.zeros((B, HP), jnp.float32).at[:, :H].set(h[0])
    c0 = jnp.zeros((B, HP), jnp.float32).at[:, :H].set(c[0])

    vmem = pl.BlockSpec(memory_space=pltpu.MemorySpace.VMEM)
    y_flat, h_fin, c_fin = pl.pallas_call(
        qnet_kernel,
        out_shape=(
            jax.ShapeDtypeStruct((T * B, AP), jnp.float32),
            jax.ShapeDtypeStruct((B, HP), jnp.float32),
            jax.ShapeDtypeStruct((B, HP), jnp.float32),
        ),
        in_specs=[vmem] * 10,
        out_specs=(vmem, vmem, vmem),
        scratch_shapes=[
            pltpu.VMEM((T * B, 4 * HP), jnp.float32),   # gx  (gate pre-acts)
            pltpu.VMEM((T * B, HP), jnp.float32),       # hseq (per-step h)
        ],
        # TODO(synk): at production batch sizes, add a batch grid axis with
        # dimension_semantics=("parallel", ...) to use v7x's second TensorCore
        # and budget scratch against its 64 MiB VMEM.
    )(x_flat, h0, c0, w1_p, b1_p, wih_p, whh_p, b_lstm_p, w2_p, b2_p)

    y = jnp.transpose(y_flat[:, :A].reshape(T, B, A), (1, 0, 2))  # (B, T, A)
    return y, h_fin[:, :H][None], c_fin[:, :H][None]


# ------------------------- pure-JAX reference ------------------------------ #
def qnet_reference(x, h, c, params):
    w1, b1, wih, whh, b_lstm, w2, b2 = params
    H = w1.shape[1]
    z = jnp.maximum(jnp.einsum("bts,sh->bth", x, w1) + b1, 0.0)

    def step(carry, z_t):
        hh, cc = carry
        gates = z_t @ wih + hh @ whh + b_lstm
        i_g = jax.nn.sigmoid(gates[:, 0 * H:1 * H])
        f_g = jax.nn.sigmoid(gates[:, 1 * H:2 * H])
        g_g = jnp.tanh(gates[:, 2 * H:3 * H])
        o_g = jax.nn.sigmoid(gates[:, 3 * H:4 * H])
        c_new = f_g * cc + i_g * g_g
        h_new = o_g * jnp.tanh(c_new)
        return (h_new, c_new), h_new

    (h_fin, c_fin), hs = lax.scan(step, (h[0], c[0]),
                                  jnp.transpose(z, (1, 0, 2)))
    hs = jnp.transpose(hs, (1, 0, 2))
    y = hs @ w2 + b2
    return y, h_fin[None], c_fin[None]


# ----------------------------- parameter init ------------------------------ #
def init_params(key, state_space, hidden, action_space):
    ks = jax.random.split(key, 7)

    def u(k, shape, fan_in):
        bound = 1.0 / jnp.sqrt(fan_in)
        return jax.random.uniform(k, shape, jnp.float32, -bound, bound)

    w1 = u(ks[0], (state_space, hidden), state_space)       # Linear1.weight.T
    b1 = u(ks[1], (1, hidden), state_space)                 # Linear1.bias
    wih = u(ks[2], (hidden, 4 * hidden), hidden)            # weight_ih_l0.T
    whh = u(ks[3], (hidden, 4 * hidden), hidden)            # weight_hh_l0.T
    b_lstm = (u(ks[4], (1, 4 * hidden), hidden)
              + u(ks[5], (1, 4 * hidden), hidden))          # bias_ih + bias_hh
    w2 = u(ks[6], (hidden, action_space), hidden)           # Linear2.weight.T
    b2 = jnp.zeros((1, action_space), jnp.float32)          # Linear2.bias
    return (w1, b1, wih, whh, b_lstm, w2, b2)


if __name__ == "__main__":
    B, T = 2, 8
    STATE_SPACE, HIDDEN, ACTION_SPACE = 8, 64, 4

    key = jax.random.PRNGKey(0)
    k_x, k_h, k_c, k_p = jax.random.split(key, 4)
    x = jax.random.normal(k_x, (B, T, STATE_SPACE), jnp.float32)
    h = 0.5 * jax.random.normal(k_h, (1, B, HIDDEN), jnp.float32)
    c = 0.5 * jax.random.normal(k_c, (1, B, HIDDEN), jnp.float32)
    params = init_params(k_p, STATE_SPACE, HIDDEN, ACTION_SPACE)

    padded = pad_params(params, HIDDEN)   # pad + bf16-cast ONCE at init

    y, new_h, new_c = qnet_forward(x, h, c, padded, action_space=ACTION_SPACE)
    jax.block_until_ready((y, new_h, new_c))

    y_ref, h_ref, c_ref = qnet_reference(x, h, c, params)
    assert y.shape == (B, T, ACTION_SPACE)
    assert new_h.shape == (1, B, HIDDEN) and new_c.shape == (1, B, HIDDEN)
    # bf16 matmul operands vs f32 reference: tolerance loosened accordingly.
    assert jnp.allclose(y, y_ref, atol=2e-2, rtol=2e-2)
    assert jnp.allclose(new_h, h_ref, atol=2e-2, rtol=2e-2)
    assert jnp.allclose(new_c, c_ref, atol=2e-2, rtol=2e-2)

    print("KERNEL_OK")
</pallas_src>

<mosaic_0001>
module attributes {stable_mosaic.version = 11 : i64} {
  func.func @qnet_kernel(%arg0: memref<16x8xbf16, #tpu.memory_space<vmem>>, %arg1: memref<2x128xf32, #tpu.memory_space<vmem>>, %arg2: memref<2x128xf32, #tpu.memory_space<vmem>>, %arg3: memref<8x128xbf16, #tpu.memory_space<vmem>>, %arg4: memref<1x128xf32, #tpu.memory_space<vmem>>, %arg5: memref<128x512xbf16, #tpu.memory_space<vmem>>, %arg6: memref<128x512xbf16, #tpu.memory_space<vmem>>, %arg7: memref<1x512xf32, #tpu.memory_space<vmem>>, %arg8: memref<128x128xbf16, #tpu.memory_space<vmem>>, %arg9: memref<1x128xf32, #tpu.memory_space<vmem>>, %arg10: memref<16x128xf32, #tpu.memory_space<vmem>>, %arg11: memref<2x128xf32, #tpu.memory_space<vmem>>, %arg12: memref<2x128xf32, #tpu.memory_space<vmem>>, %arg13: memref<16x512xf32, #tpu.memory_space<vmem>>, %arg14: memref<16x128xf32, #tpu.memory_space<vmem>>) attributes {dimension_semantics = [], scalar_prefetch = 0 : i64, scratch_operands = 2 : i64, tpu.core_type = #tpu.core_type<tc>} {
    %c0 = arith.constant 0 : index
    %c0_0 = arith.constant 0 : index
    %0 = vector.load %arg0[%c0, %c0_0] : memref<16x8xbf16, #tpu.memory_space<vmem>>, vector<16x8xbf16>
    %c0_1 = arith.constant 0 : index
    %c0_2 = arith.constant 0 : index
    %1 = vector.load %arg3[%c0_1, %c0_2] : memref<8x128xbf16, #tpu.memory_space<vmem>>, vector<8x128xbf16>
    %cst = arith.constant dense<0.000000e+00> : vector<16x128xf32>
    %2 = tpu.matmul %0, %1, %cst {dimension_numbers = #tpu.dot_dimension_numbers<[1], [0], [0], [1], [0, 0, 1, 1], [], []>} : vector<16x8xbf16>, vector<8x128xbf16>, vector<16x128xf32> -> vector<16x128xf32>
    %c0_3 = arith.constant 0 : index
    %c0_4 = arith.constant 0 : index
    %3 = vector.load %arg4[%c0_3, %c0_4] : memref<1x128xf32, #tpu.memory_space<vmem>>, vector<1x128xf32>
    %4 = vector.broadcast %3 : vector<1x128xf32> to vector<16x128xf32>
    %5 = arith.addf %2, %4 : vector<16x128xf32>
    %cst_5 = arith.constant 0.000000e+00 : f32
    %6 = vector.broadcast %cst_5 : f32 to vector<16x128xf32>
    %7 = arith.maximumf %5, %6 : vector<16x128xf32>
    %8 = arith.truncf %7 : vector<16x128xf32> to vector<16x128xbf16>
    %c0_6 = arith.constant 0 : index
    %c0_7 = arith.constant 0 : index
    %9 = vector.load %arg5[%c0_6, %c0_7] : memref<128x512xbf16, #tpu.memory_space<vmem>>, vector<128x512xbf16>
    %cst_8 = arith.constant dense<0.000000e+00> : vector<16x512xf32>
    %10 = tpu.matmul %8, %9, %cst_8 {dimension_numbers = #tpu.dot_dimension_numbers<[1], [0], [0], [1], [0, 0, 1, 1], [], []>} : vector<16x128xbf16>, vector<128x512xbf16>, vector<16x512xf32> -> vector<16x512xf32>
    %c0_9 = arith.constant 0 : index
    %c0_10 = arith.constant 0 : index
    %11 = vector.load %arg7[%c0_9, %c0_10] : memref<1x512xf32, #tpu.memory_space<vmem>>, vector<1x512xf32>
    %12 = vector.broadcast %11 : vector<1x512xf32> to vector<16x512xf32>
    %13 = arith.addf %10, %12 : vector<16x512xf32>
    %c0_11 = arith.constant 0 : index
    %c0_12 = arith.constant 0 : index
    %14 = vector.load %arg13[%c0_11, %c0_12] : memref<16x512xf32, #tpu.memory_space<vmem>>, vector<16x512xf32>
    tpu.vector_store %arg13[%c0_11, %c0_12], %13 {strides = array<i32>} : memref<16x512xf32, #tpu.memory_space<vmem>>, vector<16x512xf32>,
    %c0_13 = arith.constant 0 : index
    %c0_14 = arith.constant 0 : index
    %15 = vector.load %arg1[%c0_13, %c0_14] : memref<2x128xf32, #tpu.memory_space<vmem>>, vector<2x128xf32>
    %c0_15 = arith.constant 0 : index
    %c0_16 = arith.constant 0 : index
    %16 = vector.load %arg2[%c0_15, %c0_16] : memref<2x128xf32, #tpu.memory_space<vmem>>, vector<2x128xf32>
    %c0_17 = arith.constant 0 : index
    %c0_18 = arith.constant 0 : index
    %17 = vector.load %arg13[%c0_17, %c0_18] : memref<16x512xf32, #tpu.memory_space<vmem>>, vector<2x512xf32>
    %18 = arith.truncf %15 : vector<2x128xf32> to vector<2x128xbf16>
    %c0_19 = arith.constant 0 : index
    %c0_20 = arith.constant 0 : index
    %19 = vector.load %arg6[%c0_19, %c0_20] : memref<128x512xbf16, #tpu.memory_space<vmem>>, vector<128x512xbf16>
    %cst_21 = arith.constant dense<0.000000e+00> : vector<2x512xf32>
    %20 = tpu.matmul %18, %19, %cst_21 {dimension_numbers = #tpu.dot_dimension_numbers<[1], [0], [0], [1], [0, 0, 1, 1], [], []>} : vector<2x128xbf16>, vector<128x512xbf16>, vector<2x512xf32> -> vector<2x512xf32>
    %21 = arith.addf %17, %20 : vector<2x512xf32>
    %22 = vector.extract_strided_slice %21 {offsets = [0, 0], sizes = [2, 384], strides = [1, 1]} : vector<2x512xf32> to vector<2x384xf32>
    %23 = arith.negf %22 : vector<2x384xf32>
    %24 = math.exp %23 : vector<2x384xf32>
    %cst_22 = arith.constant 1.000000e+00 : f32
    %25 = vector.broadcast %cst_22 : f32 to vector<2x384xf32>
    %26 = arith.addf %25, %24 : vector<2x384xf32>
    %27 = arith.divf %25, %26 : vector<2x384xf32>
    %28 = vector.extract_strided_slice %27 {offsets = [0, 0], sizes = [2, 128], strides = [1, 1]} : vector<2x384xf32> to vector<2x128xf32>
    %29 = vector.extract_strided_slice %27 {offsets = [0, 128], sizes = [2, 128], strides = [1, 1]} : vector<2x384xf32> to vector<2x128xf32>
    %30 = vector.extract_strided_slice %27 {offsets = [0, 256], sizes = [2, 128], strides = [1, 1]} : vector<2x384xf32> to vector<2x128xf32>
    %31 = vector.extract_strided_slice %21 {offsets = [0, 384], sizes = [2, 128], strides = [1, 1]} : vector<2x512xf32> to vector<2x128xf32>
    %32 = math.tanh %31 : vector<2x128xf32>
    %33 = arith.mulf %29, %16 : vector<2x128xf32>
    %34 = arith.mulf %28, %32 : vector<2x128xf32>
    %35 = arith.addf %33, %34 : vector<2x128xf32>
    %36 = math.tanh %35 : vector<2x128xf32>
    %37 = arith.mulf %30, %36 : vector<2x128xf32>
    %c0_23 = arith.constant 0 : index
    %c0_24 = arith.constant 0 : index
    %38 = vector.load %arg14[%c0_23, %c0_24] : memref<16x128xf32, #tpu.memory_space<vmem>>, vector<2x128xf32>
    tpu.vector_store %arg14[%c0_23, %c0_24], %37 {strides = array<i32>} : memref<16x128xf32, #tpu.memory_space<vmem>>, vector<2x128xf32>,
    %c2 = arith.constant 2 : index
    %c0_25 = arith.constant 0 : index
    %39 = vector.load %arg13[%c2, %c0_25] : memref<16x512xf32, #tpu.memory_space<vmem>>, vector<2x512xf32>
    %40 = arith.truncf %37 : vector<2x128xf32> to vector<2x128xbf16>
    %c0_26 = arith.constant 0 : index
    %c0_27 = arith.constant 0 : index
    %41 = vector.load %arg6[%c0_26, %c0_27] : memref<128x512xbf16, #tpu.memory_space<vmem>>, vector<128x512xbf16>
    %cst_28 = arith.constant dense<0.000000e+00> : vector<2x512xf32>
    %42 = tpu.matmul %40, %41, %cst_28 {dimension_numbers = #tpu.dot_dimension_numbers<[1], [0], [0], [1], [0, 0, 1, 1], [], []>} : vector<2x128xbf16>, vector<128x512xbf16>, vector<2x512xf32> -> vector<2x512xf32>
    %43 = arith.addf %39, %42 : vector<2x512xf32>
    %44 = vector.extract_strided_slice %43 {offsets = [0, 0], sizes = [2, 384], strides = [1, 1]} : vector<2x512xf32> to vector<2x384xf32>
    %45 = arith.negf %44 : vector<2x384xf32>
    %46 = math.exp %45 : vector<2x384xf32>
    %cst_29 = arith.constant 1.000000e+00 : f32
    %47 = vector.broadcast %cst_29 : f32 to vector<2x384xf32>
    %48 = arith.addf %47, %46 : vector<2x384xf32>
    %49 = arith.divf %47, %48 : vector<2x384xf32>
    %50 = vector.extract_strided_slice %49 {offsets = [0, 0], sizes = [2, 128], strides = [1, 1]} : vector<2x384xf32> to vector<2x128xf32>
    %51 = vector.extract_strided_slice %49 {offsets = [0, 128], sizes = [2, 128], strides = [1, 1]} : vector<2x384xf32> to vector<2x128xf32>
    %52 = vector.extract_strided_slice %49 {offsets = [0, 256], sizes = [2, 128], strides = [1, 1]} : vector<2x384xf32> to vector<2x128xf32>
    %53 = vector.extract_strided_slice %43 {offsets = [0, 384], sizes = [2, 128], strides = [1, 1]} : vector<2x512xf32> to vector<2x128xf32>
    %54 = math.tanh %53 : vector<2x128xf32>
    %55 = arith.mulf %51, %35 : vector<2x128xf32>
    %56 = arith.mulf %50, %54 : vector<2x128xf32>
    %57 = arith.addf %55, %56 : vector<2x128xf32>
    %58 = math.tanh %57 : vector<2x128xf32>
    %59 = arith.mulf %52, %58 : vector<2x128xf32>
    %c2_30 = arith.constant 2 : index
    %c0_31 = arith.constant 0 : index
    %60 = vector.load %arg14[%c2_30, %c0_31] : memref<16x128xf32, #tpu.memory_space<vmem>>, vector<2x128xf32>
    tpu.vector_store %arg14[%c2_30, %c0_31], %59 {strides = array<i32>} : memref<16x128xf32, #tpu.memory_space<vmem>>, vector<2x128xf32>,
    %c4 = arith.constant 4 : index
    %c0_32 = arith.constant 0 : index
    %61 = vector.load %arg13[%c4, %c0_32] : memref<16x512xf32, #tpu.memory_space<vmem>>, vector<2x512xf32>
    %62 = arith.truncf %59 : vector<2x128xf32> to vector<2x128xbf16>
    %c0_33 = arith.constant 0 : index
    %c0_34 = arith.constant 0 : index
    %63 = vector.load %arg6[%c0_33, %c0_34] : memref<128x512xbf16, #tpu.memory_space<vmem>>, vector<128x512xbf16>
    %cst_35 = arith.constant dense<0.000000e+00> : vector<2x512xf32>
    %64 = tpu.matmul %62, %63, %cst_35 {dimension_numbers = #tpu.dot_dimension_numbers<[1], [0], [0], [1], [0, 0, 1, 1], [], []>} : vector<2x128xbf16>, vector<128x512xbf16>, vector<2x512xf32> -> vector<2x512xf32>
    %65 = arith.addf %61, %64 : vector<2x512xf32>
    %66 = vector.extract_strided_slice %65 {offsets = [0, 0], sizes = [2, 384], strides = [1, 1]} : vector<2x512xf32> to vector<2x384xf32>
    %67 = arith.negf %66 : vector<2x384xf32>
    %68 = math.exp %67 : vector<2x384xf32>
    %cst_36 = arith.constant 1.000000e+00 : f32
    %69 = vector.broadcast %cst_36 : f32 to vector<2x384xf32>
    %70 = arith.addf %69, %68 : vector<2x384xf32>
    %71 = arith.divf %69, %70 : vector<2x384xf32>
    %72 = vector.extract_strided_slice %71 {offsets = [0, 0], sizes = [2, 128], strides = [1, 1]} : vector<2x384xf32> to vector<2x128xf32>
    %73 = vector.extract_strided_slice %71 {offsets = [0, 128], sizes = [2, 128], strides = [1, 1]} : vector<2x384xf32> to vector<2x128xf32>
    %74 = vector.extract_strided_slice %71 {offsets = [0, 256], sizes = [2, 128], strides = [1, 1]} : vector<2x384xf32> to vector<2x128xf32>
    %75 = vector.extract_strided_slice %65 {offsets = [0, 384], sizes = [2, 128], strides = [1, 1]} : vector<2x512xf32> to vector<2x128xf32>
    %76 = math.tanh %75 : vector<2x128xf32>
    %77 = arith.mulf %73, %57 : vector<2x128xf32>
    %78 = arith.mulf %72, %76 : vector<2x128xf32>
    %79 = arith.addf %77, %78 : vector<2x128xf32>
    %80 = math.tanh %79 : vector<2x128xf32>
    %81 = arith.mulf %74, %80 : vector<2x128xf32>
    %c4_37 = arith.constant 4 : index
    %c0_38 = arith.constant 0 : index
    %82 = vector.load %arg14[%c4_37, %c0_38] : memref<16x128xf32, #tpu.memory_space<vmem>>, vector<2x128xf32>
    tpu.vector_store %arg14[%c4_37, %c0_38], %81 {strides = array<i32>} : memref<16x128xf32, #tpu.memory_space<vmem>>, vector<2x128xf32>,
    %c6 = arith.constant 6 : index
    %c0_39 = arith.constant 0 : index
    %83 = vector.load %arg13[%c6, %c0_39] : memref<16x512xf32, #tpu.memory_space<vmem>>, vector<2x512xf32>
    %84 = arith.truncf %81 : vector<2x128xf32> to vector<2x128xbf16>
    %c0_40 = arith.constant 0 : index
    %c0_41 = arith.constant 0 : index
    %85 = vector.load %arg6[%c0_40, %c0_41] : memref<128x512xbf16, #tpu.memory_space<vmem>>, vector<128x512xbf16>
    %cst_42 = arith.constant dense<0.000000e+00> : vector<2x512xf32>
    %86 = tpu.matmul %84, %85, %cst_42 {dimension_numbers = #tpu.dot_dimension_numbers<[1], [0], [0], [1], [0, 0, 1, 1], [], []>} : vector<2x128xbf16>, vector<128x512xbf16>, vector<2x512xf32> -> vector<2x512xf32>
    %87 = arith.addf %83, %86 : vector<2x512xf32>
    %88 = vector.extract_strided_slice %87 {offsets = [0, 0], sizes = [2, 384], strides = [1, 1]} : vector<2x512xf32> to vector<2x384xf32>
    %89 = arith.negf %88 : vector<2x384xf32>
    %90 = math.exp %89 : vector<2x384xf32>
    %cst_43 = arith.constant 1.000000e+00 : f32
    %91 = vector.broadcast %cst_43 : f32 to vector<2x384xf32>
    %92 = arith.addf %91, %90 : vector<2x384xf32>
    %93 = arith.divf %91, %92 : vector<2x384xf32>
    %94 = vector.extract_strided_slice %93 {offsets = [0, 0], sizes = [2, 128], strides = [1, 1]} : vector<2x384xf32> to vector<2x128xf32>
    %95 = vector.extract_strided_slice %93 {offsets = [0, 128], sizes = [2, 128], strides = [1, 1]} : vector<2x384xf32> to vector<2x128xf32>
    %96 = vector.extract_strided_slice %93 {offsets = [0, 256], sizes = [2, 128], strides = [1, 1]} : vector<2x384xf32> to vector<2x128xf32>
    %97 = vector.extract_strided_slice %87 {offsets = [0, 384], sizes = [2, 128], strides = [1, 1]} : vector<2x512xf32> to vector<2x128xf32>
    %98 = math.tanh %97 : vector<2x128xf32>
    %99 = arith.mulf %95, %79 : vector<2x128xf32>
    %100 = arith.mulf %94, %98 : vector<2x128xf32>
    %101 = arith.addf %99, %100 : vector<2x128xf32>
    %102 = math.tanh %101 : vector<2x128xf32>
    %103 = arith.mulf %96, %102 : vector<2x128xf32>
    %c6_44 = arith.constant 6 : index
    %c0_45 = arith.constant 0 : index
    %104 = vector.load %arg14[%c6_44, %c0_45] : memref<16x128xf32, #tpu.memory_space<vmem>>, vector<2x128xf32>
    tpu.vector_store %arg14[%c6_44, %c0_45], %103 {strides = array<i32>} : memref<16x128xf32, #tpu.memory_space<vmem>>, vector<2x128xf32>,
    %c8 = arith.constant 8 : index
    %c0_46 = arith.constant 0 : index
    %105 = vector.load %arg13[%c8, %c0_46] : memref<16x512xf32, #tpu.memory_space<vmem>>, vector<2x512xf32>
    %106 = arith.truncf %103 : vector<2x128xf32> to vector<2x128xbf16>
    %c0_47 = arith.constant 0 : index
    %c0_48 = arith.constant 0 : index
    %107 = vector.load %arg6[%c0_47, %c0_48] : memref<128x512xbf16, #tpu.memory_space<vmem>>, vector<128x512xbf16>
    %cst_49 = arith.constant dense<0.000000e+00> : vector<2x512xf32>
    %108 = tpu.matmul %106, %107, %cst_49 {dimension_numbers = #tpu.dot_dimension_numbers<[1], [0], [0], [1], [0, 0, 1, 1], [], []>} : vector<2x128xbf16>, vector<128x512xbf16>, vector<2x512xf32> -> vector<2x512xf32>
    %109 = arith.addf %105, %108 : vector<2x512xf32>
    %110 = vector.extract_strided_slice %109 {offsets = [0, 0], sizes = [2, 384], strides = [1, 1]} : vector<2x512xf32> to vector<2x384xf32>
    %111 = arith.negf %110 : vector<2x384xf32>
    %112 = math.exp %111 : vector<2x384xf32>
    %cst_50 = arith.constant 1.000000e+00 : f32
    %113 = vector.broadcast %cst_50 : f32 to vector<2x384xf32>
    %114 = arith.addf %113, %112 : vector<2x384xf32>
    %115 = arith.divf %113, %114 : vector<2x384xf32>
    %116 = vector.extract_strided_slice %115 {offsets = [0, 0], sizes = [2, 128], strides = [1, 1]} : vector<2x384xf32> to vector<2x128xf32>
    %117 = vector.extract_strided_slice %115 {offsets = [0, 128], sizes = [2, 128], strides = [1, 1]} : vector<2x384xf32> to vector<2x128xf32>
    %118 = vector.extract_strided_slice %115 {offsets = [0, 256], sizes = [2, 128], strides = [1, 1]} : vector<2x384xf32> to vector<2x128xf32>
    %119 = vector.extract_strided_slice %109 {offsets = [0, 384], sizes = [2, 128], strides = [1, 1]} : vector<2x512xf32> to vector<2x128xf32>
    %120 = math.tanh %119 : vector<2x128xf32>
    %121 = arith.mulf %117, %101 : vector<2x128xf32>
    %122 = arith.mulf %116, %120 : vector<2x128xf32>
    %123 = arith.addf %121, %122 : vector<2x128xf32>
    %124 = math.tanh %123 : vector<2x128xf32>
    %125 = arith.mulf %118, %124 : vector<2x128xf32>
    %c8_51 = arith.constant 8 : index
    %c0_52 = arith.constant 0 : index
    %126 = vector.load %arg14[%c8_51, %c0_52] : memref<16x128xf32, #tpu.memory_space<vmem>>, vector<2x128xf32>
    tpu.vector_store %arg14[%c8_51, %c0_52], %125 {strides = array<i32>} : memref<16x128xf32, #tpu.memory_space<vmem>>, vector<2x128xf32>,
    %c10 = arith.constant 10 : index
    %c0_53 = arith.constant 0 : index
    %127 = vector.load %arg13[%c10, %c0_53] : memref<16x512xf32, #tpu.memory_space<vmem>>, vector<2x512xf32>
    %128 = arith.truncf %125 : vector<2x128xf32> to vector<2x128xbf16>
    %c0_54 = arith.constant 0 : index
    %c0_55 = arith.constant 0 : index
    %129 = vector.load %arg6[%c0_54, %c0_55] : memref<128x512xbf16, #tpu.memory_space<vmem>>, vector<128x512xbf16>
    %cst_56 = arith.constant dense<0.000000e+00> : vector<2x512xf32>
    %130 = tpu.matmul %128, %129, %cst_56 {dimension_numbers = #tpu.dot_dimension_numbers<[1], [0], [0], [1], [0, 0, 1, 1], [], []>} : vector<2x128xbf16>, vector<128x512xbf16>, vector<2x512xf32> -> vector<2x512xf32>
    %131 = arith.addf %127, %130 : vector<2x512xf32>
    %132 = vector.extract_strided_slice %131 {offsets = [0, 0], sizes = [2, 384], strides = [1, 1]} : vector<2x512xf32> to vector<2x384xf32>
    %133 = arith.negf %132 : vector<2x384xf32>
    %134 = math.exp %133 : vector<2x384xf32>
    %cst_57 = arith.constant 1.000000e+00 : f32
    %135 = vector.broadcast %cst_57 : f32 to vector<2x384xf32>
    %136 = arith.addf %135, %134 : vector<2x384xf32>
    %137 = arith.divf %135, %136 : vector<2x384xf32>
    %138 = vector.extract_strided_slice %137 {offsets = [0, 0], sizes = [2, 128], strides = [1, 1]} : vector<2x384xf32> to vector<2x128xf32>
    %139 = vector.extract_strided_slice %137 {offsets = [0, 128], sizes = [2, 128], strides = [1, 1]} : vector<2x384xf32> to vector<2x128xf32>
    %140 = vector.extract_strided_slice %137 {offsets = [0, 256], sizes = [2, 128], strides = [1, 1]} : vector<2x384xf32> to vector<2x128xf32>
    %141 = vector.extract_strided_slice %131 {offsets = [0, 384], sizes = [2, 128], strides = [1, 1]} : vector<2x512xf32> to vector<2x128xf32>
    %142 = math.tanh %141 : vector<2x128xf32>
    %143 = arith.mulf %139, %123 : vector<2x128xf32>
    %144 = arith.mulf %138, %142 : vector<2x128xf32>
    %145 = arith.addf %143, %144 : vector<2x128xf32>
    %146 = math.tanh %145 : vector<2x128xf32>
    %147 = arith.mulf %140, %146 : vector<2x128xf32>
    %c10_58 = arith.constant 10 : index
    %c0_59 = arith.constant 0 : index
    %148 = vector.load %arg14[%c10_58, %c0_59] : memref<16x128xf32, #tpu.memory_space<vmem>>, vector<2x128xf32>
    tpu.vector_store %arg14[%c10_58, %c0_59], %147 {strides = array<i32>} : memref<16x128xf32, #tpu.memory_space<vmem>>, vector<2x128xf32>,
    %c12 = arith.constant 12 : index
    %c0_60 = arith.constant 0 : index
    %149 = vector.load %arg13[%c12, %c0_60] : memref<16x512xf32, #tpu.memory_space<vmem>>, vector<2x512xf32>
    %150 = arith.truncf %147 : vector<2x128xf32> to vector<2x128xbf16>
    %c0_61 = arith.constant 0 : index
    %c0_62 = arith.constant 0 : index
    %151 = vector.load %arg6[%c0_61, %c0_62] : memref<128x512xbf16, #tpu.memory_space<vmem>>, vector<128x512xbf16>
    %cst_63 = arith.constant dense<0.000000e+00> : vector<2x512xf32>
    %152 = tpu.matmul %150, %151, %cst_63 {dimension_numbers = #tpu.dot_dimension_numbers<[1], [0], [0], [1], [0, 0, 1, 1], [], []>} : vector<2x128xbf16>, vector<128x512xbf16>, vector<2x512xf32> -> vector<2x512xf32>
    %153 = arith.addf %149, %152 : vector<2x512xf32>
    %154 = vector.extract_strided_slice %153 {offsets = [0, 0], sizes = [2, 384], strides = [1, 1]} : vector<2x512xf32> to vector<2x384xf32>
    %155 = arith.negf %154 : vector<2x384xf32>
    %156 = math.exp %155 : vector<2x384xf32>
    %cst_64 = arith.constant 1.000000e+00 : f32
    %157 = vector.broadcast %cst_64 : f32 to vector<2x384xf32>
    %158 = arith.addf %157, %156 : vector<2x384xf32>
    %159 = arith.divf %157, %158 : vector<2x384xf32>
    %160 = vector.extract_strided_slice %159 {offsets = [0, 0], sizes = [2, 128], strides = [1, 1]} : vector<2x384xf32> to vector<2x128xf32>
    %161 = vector.extract_strided_slice %159 {offsets = [0, 128], sizes = [2, 128], strides = [1, 1]} : vector<2x384xf32> to vector<2x128xf32>
    %162 = vector.extract_strided_slice %159 {offsets = [0, 256], sizes = [2, 128], strides = [1, 1]} : vector<2x384xf32> to vector<2x128xf32>
    %163 = vector.extract_strided_slice %153 {offsets = [0, 384], sizes = [2, 128], strides = [1, 1]} : vector<2x512xf32> to vector<2x128xf32>
    %164 = math.tanh %163 : vector<2x128xf32>
    %165 = arith.mulf %161, %145 : vector<2x128xf32>
    %166 = arith.mulf %160, %164 : vector<2x128xf32>
    %167 = arith.addf %165, %166 : vector<2x128xf32>
    %168 = math.tanh %167 : vector<2x128xf32>
    %169 = arith.mulf %162, %168 : vector<2x128xf32>
    %c12_65 = arith.constant 12 : index
    %c0_66 = arith.constant 0 : index
    %170 = vector.load %arg14[%c12_65, %c0_66] : memref<16x128xf32, #tpu.memory_space<vmem>>, vector<2x128xf32>
    tpu.vector_store %arg14[%c12_65, %c0_66], %169 {strides = array<i32>} : memref<16x128xf32, #tpu.memory_space<vmem>>, vector<2x128xf32>,
    %c14 = arith.constant 14 : index
    %c0_67 = arith.constant 0 : index
    %171 = vector.load %arg13[%c14, %c0_67] : memref<16x512xf32, #tpu.memory_space<vmem>>, vector<2x512xf32>
    %172 = arith.truncf %169 : vector<2x128xf32> to vector<2x128xbf16>
    %c0_68 = arith.constant 0 : index
    %c0_69 = arith.constant 0 : index
    %173 = vector.load %arg6[%c0_68, %c0_69] : memref<128x512xbf16, #tpu.memory_space<vmem>>, vector<128x512xbf16>
    %cst_70 = arith.constant dense<0.000000e+00> : vector<2x512xf32>
    %174 = tpu.matmul %172, %173, %cst_70 {dimension_numbers = #tpu.dot_dimension_numbers<[1], [0], [0], [1], [0, 0, 1, 1], [], []>} : vector<2x128xbf16>, vector<128x512xbf16>, vector<2x512xf32> -> vector<2x512xf32>
    %175 = arith.addf %171, %174 : vector<2x512xf32>
    %176 = vector.extract_strided_slice %175 {offsets = [0, 0], sizes = [2, 384], strides = [1, 1]} : vector<2x512xf32> to vector<2x384xf32>
    %177 = arith.negf %176 : vector<2x384xf32>
    %178 = math.exp %177 : vector<2x384xf32>
    %cst_71 = arith.constant 1.000000e+00 : f32
    %179 = vector.broadcast %cst_71 : f32 to vector<2x384xf32>
    %180 = arith.addf %179, %178 : vector<2x384xf32>
    %181 = arith.divf %179, %180 : vector<2x384xf32>
    %182 = vector.extract_strided_slice %181 {offsets = [0, 0], sizes = [2, 128], strides = [1, 1]} : vector<2x384xf32> to vector<2x128xf32>
    %183 = vector.extract_strided_slice %181 {offsets = [0, 128], sizes = [2, 128], strides = [1, 1]} : vector<2x384xf32> to vector<2x128xf32>
    %184 = vector.extract_strided_slice %181 {offsets = [0, 256], sizes = [2, 128], strides = [1, 1]} : vector<2x384xf32> to vector<2x128xf32>
    %185 = vector.extract_strided_slice %175 {offsets = [0, 384], sizes = [2, 128], strides = [1, 1]} : vector<2x512xf32> to vector<2x128xf32>
    %186 = math.tanh %185 : vector<2x128xf32>
    %187 = arith.mulf %183, %167 : vector<2x128xf32>
    %188 = arith.mulf %182, %186 : vector<2x128xf32>
    %189 = arith.addf %187, %188 : vector<2x128xf32>
    %190 = math.tanh %189 : vector<2x128xf32>
    %191 = arith.mulf %184, %190 : vector<2x128xf32>
    %c14_72 = arith.constant 14 : index
    %c0_73 = arith.constant 0 : index
    %192 = vector.load %arg14[%c14_72, %c0_73] : memref<16x128xf32, #tpu.memory_space<vmem>>, vector<2x128xf32>
    tpu.vector_store %arg14[%c14_72, %c0_73], %191 {strides = array<i32>} : memref<16x128xf32, #tpu.memory_space<vmem>>, vector<2x128xf32>,
    %c0_74 = arith.constant 0 : index
    %c0_75 = arith.constant 0 : index
    %193 = vector.load %arg11[%c0_74, %c0_75] : memref<2x128xf32, #tpu.memory_space<vmem>>, vector<2x128xf32>
    tpu.vector_store %arg11[%c0_74, %c0_75], %191 {strides = array<i32>} : memref<2x128xf32, #tpu.memory_space<vmem>>, vector<2x128xf32>,
    %c0_76 = arith.constant 0 : index
    %c0_77 = arith.constant 0 : index
    %194 = vector.load %arg12[%c0_76, %c0_77] : memref<2x128xf32, #tpu.memory_space<vmem>>, vector<2x128xf32>
    tpu.vector_store %arg12[%c0_76, %c0_77], %189 {strides = array<i32>} : memref<2x128xf32, #tpu.memory_space<vmem>>, vector<2x128xf32>,
    %c0_78 = arith.constant 0 : index
    %c0_79 = arith.constant 0 : index
    %195 = vector.load %arg14[%c0_78, %c0_79] : memref<16x128xf32, #tpu.memory_space<vmem>>, vector<16x128xf32>
    %196 = arith.truncf %195 : vector<16x128xf32> to vector<16x128xbf16>
    %c0_80 = arith.constant 0 : index
    %c0_81 = arith.constant 0 : index
    %197 = vector.load %arg8[%c0_80, %c0_81] : memref<128x128xbf16, #tpu.memory_space<vmem>>, vector<128x128xbf16>
    %cst_82 = arith.constant dense<0.000000e+00> : vector<16x128xf32>
    %198 = tpu.matmul %196, %197, %cst_82 {dimension_numbers = #tpu.dot_dimension_numbers<[1], [0], [0], [1], [0, 0, 1, 1], [], []>} : vector<16x128xbf16>, vector<128x128xbf16>, vector<16x128xf32> -> vector<16x128xf32>
    %c0_83 = arith.constant 0 : index
    %c0_84 = arith.constant 0 : index
    %199 = vector.load %arg9[%c0_83, %c0_84] : memref<1x128xf32, #tpu.memory_space<vmem>>, vector<1x128xf32>
    %200 = vector.broadcast %199 : vector<1x128xf32> to vector<16x128xf32>
    %201 = arith.addf %198, %200 : vector<16x128xf32>
    %c0_85 = arith.constant 0 : index
    %c0_86 = arith.constant 0 : index
    %202 = vector.load %arg10[%c0_85, %c0_86] : memref<16x128xf32, #tpu.memory_space<vmem>>, vector<16x128xf32>
    tpu.vector_store %arg10[%c0_85, %c0_86], %201 {strides = array<i32>} : memref<16x128xf32, #tpu.memory_space<vmem>>, vector<16x128xf32>,
    return
  }
}

</mosaic_0001>

<bundles_post_ra>
// kernel: qnet_forward.1
= control target key start
LH: loop header
LB: loop body
LE: loop exit
PB: predicated region body
PF: predicated region fallthrough
CT: control target
= control target key end

     0   :  { %18 = vsyncpa [#allocation5], 0  ;;  %s4442_s0 = inlined_call_operand.vmem [shape: bf16[16,8], index: 0, kind: input, shape index: {}]   ;;  %s4443_s1 = inlined_call_operand.vmem [shape: f32[2,128], index: 1, kind: input, shape index: {}]   ;;  %s4444_s2 = inlined_call_operand.vmem [shape: f32[2,128], index: 2, kind: input, shape index: {}]   ;;  %s4445_s3 = inlined_call_operand.vmem [shape: bf16[8,128], index: 3, kind: input, shape index: {}]   ;;  %s4446_s4 = inlined_call_operand.vmem [shape: f32[1,128], index: 4, kind: input, shape index: {}]   ;;  %s4447_s5 = inlined_call_operand.hbm [shape: bf16[128,512], index: 5, kind: input, shape index: {}]   ;;  %s4448_s6 = inlined_call_operand.hbm [shape: bf16[128,512], index: 6, kind: input, shape index: {}]   ;;  %s4449_s7 = inlined_call_operand.vmem [shape: f32[1,512], index: 7, kind: input, shape index: {}]   ;;  %s4450_s8 = inlined_call_operand.vmem [shape: bf16[128,128], index: 8, kind: input, shape index: {}]   ;;  %s4451_s9 = inlined_call_operand.vmem [shape: f32[1,128], index: 9, kind: input, shape index: {}]   ;;  %s4452_s10 = inlined_call_operand.vmem [shape: f32[16,128], index: 10, kind: output, shape index: {0}]   ;;  %s4453_s11 = inlined_call_operand.vmem [shape: f32[2,128], index: 11, kind: output, shape index: {1}]   ;;  %s4454_s12 = inlined_call_operand.vmem [shape: f32[2,128], index: 12, kind: output, shape index: {2}]  }
   0x1   :  { %19 = vsyncpa [#allocation7], 0  ;;  %s3846_s21 = smov [#allocation4]   ;;  %s3798_s25 = scalar_lea.hbm %s4447_s5, 4096 }
   0x2   :  { %s35_s22 = sshll.u32 %s3846_s21, 4  ;;  %p3799_p0 = scmp.ne.s32.totalorder %s4447_s5, %s3798_s25  ;;  %s36_s22 = int_to_ptr.vmem [resolvable:$true] %s35_s22 }
   0x3   :  { %p3802_p1 = scmp.lt.u32.totalorder %s3798_s25, %s4447_s5 }
   0x5   :  { %p3804_p2 = pnand %p3802_p1, %p3799_p0 }
   0x7   :  { %3807 = shalt.err (!%p3804_p2)
}
   0x8   :  { %s3808_s30 = scalar_lea.vmem %s36_s22, 4096  ;;  %p3813_p4 = scmp.lt.s32.totalorder %s36_s22, %s36_s22 }
   0x9   :  { %p3809_p3 = scmp.ne.s32.totalorder %s36_s22, %s3808_s30  ;;  %p3814_p5 = scmp.lt.s32.totalorder %s3808_s30, %s3808_s30 }
   0xb   :  { %p3815_p6 = por %p3814_p5, %p3813_p4 }
   0xd   :  { %p3816_p7 = pnand %p3815_p6, %p3809_p3 }
   0xf   :  { %3819 = shalt.err (!%p3816_p7)
}
  0x10   :  { %s3847_s13 = smov 256   ;;  %s3848_s14 = smov 16  }
  0x11   :  { %41 = dma.hbm_to_vmem [thread:$0]  %s4447_s5, 4096, %s36_s22, [#allocation5], %s3847_s13, %s3847_s13, %s3848_s14  }
  0x12   :  { %s3849_s17 = smov [#allocation6]   ;;  %s3820_s21 = scalar_lea.hbm %s4448_s6, 4096 }
  0x13   :  { %s47_s18 = sshll.u32 %s3849_s17, 4  ;;  %p3821_p8 = scmp.ne.s32.totalorder %s4448_s6, %s3820_s21  ;;  %s48_s18 = int_to_ptr.vmem [resolvable:$true] %s47_s18 }
  0x14   :  { %p3824_p9 = scmp.lt.u32.totalorder %s3820_s21, %s4448_s6 }
  0x16   :  { %p3826_p10 = pnand %p3824_p9, %p3821_p8 }
  0x18   :  { %3829 = shalt.err (!%p3826_p10)
}
  0x19   :  { %s3830_s27 = scalar_lea.vmem %s48_s18, 4096  ;;  %p3835_p12 = scmp.lt.s32.totalorder %s48_s18, %s48_s18 }
  0x1a   :  { %p3831_p11 = scmp.ne.s32.totalorder %s48_s18, %s3830_s27  ;;  %p3836_p13 = scmp.lt.s32.totalorder %s3830_s27, %s3830_s27 }
  0x1c   :  { %p3837_p0 = por %p3836_p13, %p3835_p12 }
  0x1e   :  { %p3838_p1 = pnand %p3837_p0, %p3831_p11 }
  0x20   :  { %3841 = shalt.err (!%p3838_p1)
}
  0x21   :  { %53 = dma.hbm_to_vmem [thread:$0]  %s4448_s6, 4096, %s48_s18, [#allocation7], %s3847_s13, %s3847_s13, %s3848_s14  }
  0x22   :  { %3842 = dma.done.wait [#allocation5], 4096  }
  0x23   :  { %3843 = vsyncadd [#allocation5], 4294963200 }
  0x24   :  { %3844 = dma.done.wait [#allocation7], 4096  }
  0x25   :  { %3845 = vsyncadd [#allocation7], 4294963200  ;;  %v3850_v0 = vmov 0.0   ;;  %vm3851_vm0 = vmmov 0   ;;  %vm86_vm1 = vcmask 1043456   ;;  %v3517_v3 = vld [vmem:[%s4442_s0] sm:$0xff]  }
  0x26   :  { %3484 = vmatprep.subr.bf16.mxu0 %v3850_v0  ;;  %3486 = vmatprep.mubr.msk.bf16.mxu0 %vm3851_vm0, %v3850_v0  ;;  %v69_v1 = vld [vmem:[%s4445_s3] sm:$0xf]  ;;  %vm82_vm2 = vcmask 64512   ;;  %v3518_v4 = vld [vmem:[#allocation4 + $0x4] ss:$16 sps:$4 sm:$0xff]   ;;  %v3852_v38 = vmov 0  }
  0x27   :  { %v88_v2 = vsel %vm86_vm1, %v69_v1, 0  ;;  %v3520_v5 = vld [vmem:[#allocation4 + $0x8] ss:$16 sps:$4 sm:$0xff]   ;;  %v3522_v6 = vld [vmem:[#allocation4 + $0xc] ss:$16 sps:$4 sm:$0xff]   ;;  %348 = vmatprep.subr.bf16.mxu1 %v3518_v4  ;;  %380 = vmatprep.mubr.bf16.mxu1 %v3852_v38 }
  0x28   :  { %3485 = vmatpush3.bf16.msra.mxu0 %v88_v2  ;;  %v3523_v7 = vld [vmem:[#allocation4] ss:$16 sps:$4 sm:$0xff]   ;;  %v3524_v8 = vld [vmem:[#allocation4 + $0x24] ss:$16 sps:$4 sm:$0xff]   ;;  %v3526_v9 = vld [vmem:[#allocation4 + $0x28] ss:$16 sps:$4 sm:$0xff]  }
  0x29   :  { %391 = vmatprep.subr.bf16.mxu0 %v3522_v6  ;;  %349 = vmatpush1.bf16.msra.mxu1 %v3523_v7  ;;  %v3528_v10 = vld [vmem:[#allocation4 + $0x2c] ss:$16 sps:$4 sm:$0xff]   ;;  %v3529_v11 = vld [vmem:[#allocation4 + $0x20] ss:$16 sps:$4 sm:$0xff]   ;;  %v3530_v12 = vld [vmem:[#allocation4 + $0x44] ss:$16 sps:$4 sm:$0xff]  }
  0x2a   :  { %350 = vmatprep.subr.bf16.mxu1 %v3524_v8  ;;  %v3534_v13 = vld [vmem:[#allocation4 + $0x4c] ss:$16 sps:$4 sm:$0xff]   ;;  %v3532_v14 = vld [vmem:[#allocation4 + $0x48] ss:$16 sps:$4 sm:$0xff]   ;;  %v3535_v15 = vld [vmem:[#allocation4 + $0x40] ss:$16 sps:$4 sm:$0xff]  }
  0x2b   :  { %3487 = vmatmul.mubr.msk.bf16.vlgmr.msra.gmra.mrb[0].mxu0 %vm82_vm2, %v3517_v3  ;;  %v3536_v16 = vld [vmem:[#allocation4 + $0x64] ss:$16 sps:$4 sm:$0xff]   ;;  %v3540_v17 = vld [vmem:[#allocation4 + $0x6c] ss:$16 sps:$4 sm:$0xff]   ;;  %v3538_v18 = vld [vmem:[#allocation4 + $0x68] ss:$16 sps:$4 sm:$0xff]  }
  0x2c   :  { %392 = vmatpush1.bf16.msra.mxu0 %v3520_v5  ;;  %v3541_v19 = vld [vmem:[#allocation4 + $0x60] ss:$16 sps:$4 sm:$0xff]   ;;  %v3542_v20 = vld [vmem:[#allocation4 + $0x84] ss:$16 sps:$4 sm:$0xff]   ;;  %v3546_v21 = vld [vmem:[#allocation4 + $0x8c] ss:$16 sps:$4 sm:$0xff]   ;;  %423 = vmatprep.mubr.bf16.mxu0 %v3852_v38 }
  0x2d   :  { %393 = vmatprep.subr.bf16.mxu0 %v3528_v10  ;;  %351 = vmatpush1.bf16.msra.mxu1 %v3529_v11  ;;  %v3544_v22 = vld [vmem:[#allocation4 + $0x88] ss:$16 sps:$4 sm:$0xff]   ;;  %v3547_v23 = vld [vmem:[#allocation4 + $0x80] ss:$16 sps:$4 sm:$0xff]   ;;  %v3548_v24 = vld [vmem:[#allocation4 + $0xa4] ss:$16 sps:$4 sm:$0xff]  }
  0x2e   :  { %352 = vmatprep.subr.bf16.mxu1 %v3530_v12  ;;  %v3552_v25 = vld [vmem:[#allocation4 + $0xac] ss:$16 sps:$4 sm:$0xff]   ;;  %v3550_v26 = vld [vmem:[#allocation4 + $0xa8] ss:$16 sps:$4 sm:$0xff]   ;;  %v3553_v27 = vld [vmem:[#allocation4 + $0xa0] ss:$16 sps:$4 sm:$0xff]  }
  0x2f   :  { %v3554_v28 = vld [vmem:[#allocation4 + $0xc4] ss:$16 sps:$4 sm:$0xff]   ;;  %v3558_v29 = vld [vmem:[#allocation4 + $0xcc] ss:$16 sps:$4 sm:$0xff]   ;;  %v3556_v30 = vld [vmem:[#allocation4 + $0xc8] ss:$16 sps:$4 sm:$0xff]  }
  0x30   :  { %394 = vmatpush1.bf16.msra.mxu0 %v3526_v9  ;;  %v3559_v31 = vld [vmem:[#allocation4 + $0xc0] ss:$16 sps:$4 sm:$0xff]   ;;  %v3560_v32 = vld [vmem:[#allocation4 + $0xe4] ss:$16 sps:$4 sm:$0xff]   ;;  %v3564_v33 = vld [vmem:[#allocation4 + $0xec] ss:$16 sps:$4 sm:$0xff]  }
  0x31   :  { %395 = vmatprep.subr.bf16.mxu0 %v3534_v13  ;;  %353 = vmatpush1.bf16.msra.mxu1 %v3535_v15  ;;  %v3562_v34 = vld [vmem:[#allocation4 + $0xe8] ss:$16 sps:$4 sm:$0xff]   ;;  %v3565_v35 = vld [vmem:[#allocation4 + $0xe0] ss:$16 sps:$4 sm:$0xff]   ;;  %v3951_v36 = vld [vmem:[#allocation6 + $0x4] ss:$16 sps:$4 sm:$0xff]  }
  0x32   :  { %354 = vmatprep.subr.bf16.mxu1 %v3536_v16  ;;  %v3953_v37 = vld [vmem:[#allocation6 + $0xc] ss:$16 sps:$4 sm:$0xff]   ;;  %v3149_v39 = vld [vmem:[%s4446_s4] ss:$0 sm:$0xff]  ;;  %v3964_v49 = vld [vmem:[#allocation6 + $0x8] ss:$16 sps:$4 sm:$0xff]  }
  0x33   :  { %v3962_v48 = vld [vmem:[#allocation6] ss:$16 sps:$4 sm:$0xff]   ;;  %v3966_v51 = vld [vmem:[#allocation6 + $0x24] ss:$16 sps:$4 sm:$0xff]   ;;  %v3968_v52 = vld [vmem:[#allocation6 + $0x2c] ss:$16 sps:$4 sm:$0xff]  }
  0x34   :  { %396 = vmatpush1.bf16.msra.mxu0 %v3532_v14  ;;  %v3972_v53 = vld [vmem:[#allocation6 + $0x20] ss:$16 sps:$4 sm:$0xff]   ;;  %v3974_v54 = vld [vmem:[#allocation6 + $0x28] ss:$16 sps:$4 sm:$0xff]   ;;  %v3978_v55 = vld [vmem:[#allocation6 + $0x44] ss:$16 sps:$4 sm:$0xff]  }
  0x35   :  { %397 = vmatprep.subr.bf16.mxu0 %v3540_v17  ;;  %355 = vmatpush1.bf16.msra.mxu1 %v3541_v19  ;;  %v3980_v56 = vld [vmem:[#allocation6 + $0x4c] ss:$16 sps:$4 sm:$0xff]   ;;  %v3986_v57 = vld [vmem:[#allocation6 + $0x40] ss:$16 sps:$4 sm:$0xff]   ;;  %v3988_v58 = vld [vmem:[#allocation6 + $0x48] ss:$16 sps:$4 sm:$0xff]  }
  0x36   :  { %356 = vmatprep.subr.bf16.mxu1 %v3542_v20  ;;  %v3992_v59 = vld [vmem:[#allocation6 + $0x64] ss:$16 sps:$4 sm:$0xff]   ;;  %v3994_v60 = vld [vmem:[#allocation6 + $0x6c] ss:$16 sps:$4 sm:$0xff]   ;;  %v3998_v61 = vld [vmem:[#allocation6 + $0x60] ss:$16 sps:$4 sm:$0xff]  }
  0x37   :  { %v4000_v62 = vld [vmem:[#allocation6 + $0x68] ss:$16 sps:$4 sm:$0xff]   ;;  %v4004_v63 = vld [vmem:[#allocation6 + $0x84] ss:$16 sps:$4 sm:$0xff]   ;;  %v4006_v1 = vld [vmem:[#allocation6 + $0x8c] ss:$16 sps:$4 sm:$0xff]  }
  0x38   :  { %398 = vmatpush1.bf16.msra.mxu0 %v3538_v18  ;;  %v4010_v2 = vld [vmem:[#allocation6 + $0x80] ss:$16 sps:$4 sm:$0xff]   ;;  %v4012_v3 = vld [vmem:[#allocation6 + $0x88] ss:$16 sps:$4 sm:$0xff]   ;;  %v4016_v4 = vld [vmem:[#allocation6 + $0xa4] ss:$16 sps:$4 sm:$0xff]   ;;  %v168_v18 = vlaneseq }
  0x39   :  { %399 = vmatprep.subr.bf16.mxu0 %v3546_v21  ;;  %357 = vmatpush1.bf16.msra.mxu1 %v3547_v23  ;;  %v4018_v5 = vld [vmem:[#allocation6 + $0xac] ss:$16 sps:$4 sm:$0xff]   ;;  %v4022_v6 = vld [vmem:[#allocation6 + $0xa0] ss:$16 sps:$4 sm:$0xff]   ;;  %v4024_v7 = vld [vmem:[#allocation6 + $0xa8] ss:$16 sps:$4 sm:$0xff]  }
  0x3a   :  { %358 = vmatprep.subr.bf16.mxu1 %v3548_v24  ;;  %v4028_v8 = vld [vmem:[#allocation6 + $0xc4] ss:$16 sps:$4 sm:$0xff]   ;;  %v4030_v9 = vld [vmem:[#allocation6 + $0xcc] ss:$16 sps:$4 sm:$0xff]   ;;  %v4034_v10 = vld [vmem:[#allocation6 + $0xc0] ss:$16 sps:$4 sm:$0xff]  }
  0x3b   :  { %v4036_v11 = vld [vmem:[#allocation6 + $0xc8] ss:$16 sps:$4 sm:$0xff]   ;;  %v4040_v12 = vld [vmem:[#allocation6 + $0xe4] ss:$16 sps:$4 sm:$0xff]   ;;  %v4042_v13 = vld [vmem:[#allocation6 + $0xec] ss:$16 sps:$4 sm:$0xff]  }
  0x3c   :  { %400 = vmatpush1.bf16.msra.mxu0 %v3544_v22  ;;  %v4046_v14 = vld [vmem:[#allocation6 + $0xe0] ss:$16 sps:$4 sm:$0xff]   ;;  %v4048_v15 = vld [vmem:[#allocation6 + $0xe8] ss:$16 sps:$4 sm:$0xff]   ;;  %v169_v19 = vshrl.u32 %v168_v18, 7 }
  0x3d   :  { %401 = vmatprep.subr.bf16.mxu0 %v3552_v25  ;;  %359 = vmatpush1.bf16.msra.mxu1 %v3553_v27  ;;  %v442_v16 = vld [vmem:[%s4443_s1] sm:$0x3] }
  0x3e   :  { %360 = vmatprep.subr.bf16.mxu1 %v3554_v28  ;;  %v448_v17 = vpack.c.bf16 %v442_v16, %v442_v16  ;;  %v170_v20 = vsub.s32 0, %v169_v19  ;;  %v178_v21 = vsub.s32 2, %v169_v19  ;;  %v166_v22 = vld [vmem:[%s4449_s7] sm:$0xf]  ;;  %v174_v23 = vsub.s32 1, %v169_v19 }
  0x3f   :  { %v182_v24 = vsub.s32 3, %v169_v19 }
  0x40   :  { %402 = vmatpush1.bf16.msra.mxu0 %v3550_v26  ;;  %v171_v25 = vrot.slane %v166_v22, %v170_v20  ;;  %v179_v26 = vrot.slane %v166_v22, %v178_v21  ;;  %v175_v27 = vrot.slane %v166_v22, %v174_v23 }
  0x41   :  { %403 = vmatprep.subr.bf16.mxu0 %v3558_v29  ;;  %361 = vmatpush1.bf16.msra.mxu1 %v3559_v31  ;;  %v183_v28 = vrot.slane %v166_v22, %v182_v24 }
  0x42   :  { %362 = vmatprep.subr.bf16.mxu1 %v3560_v32 }
  0x44   :  { %404 = vmatpush1.bf16.msra.mxu0 %v3556_v30 }
  0x45   :  { %405 = vmatprep.subr.bf16.mxu0 %v3564_v33  ;;  %363 = vmatpush1.bf16.msra.mxu1 %v3565_v35 }
  0x46   :  { %641 = vmatprep.subr.bf16.mxu1 %v3951_v36 }
  0x48   :  { %406 = vmatpush1.bf16.msra.mxu0 %v3562_v34 }
  0x49   :  { %682 = vmatprep.subr.bf16.mxu0 %v3953_v37 }
  0xfe   :  { %v124_v40 = vpop.f32.mrb[0].mxu0 }
  0xff   :  { %v125_v41 = vadd.f32 %v3149_v39, %v124_v40  ;;  %v3488_v42 = vpop.f32.mrb[1].mxu0 }
 0x100   :  { %v127_v43 = vpop.f32.mrb[2].mxu0 }
 0x101   :  { %v128_v44 = vadd.f32 %v3149_v39, %v127_v43  ;;  %v3489_v45 = vpop.f32.mrb[3].mxu0  ;;  %v131_v46 = vmax.f32 %v125_v41, 0.0 }
 0x103   :  { %v132_v47 = vmax.f32 %v128_v44, 0.0 }
 0x105   :  { %v133_v50 = vpack.c.bf16 %v132_v47, %v131_v46 }
 0x107   :  { %381 = vmatmul.mubr.bf16.vlgmr.msra.gmra.mrb[0].mxu1 %v133_v50  ;;  %424 = vmatmul.mubr.bf16.vlgmr.msra.gmra.mrb[4].mxu0 %v133_v50 }
 0x108   :  { %642 = vmatpush1.bf16.msra.mxu1 %v3962_v48  ;;  %683 = vmatpush1.bf16.msra.mxu0 %v3964_v49 }
 0x109   :  { %643 = vmatprep.subr.bf16.mxu1 %v3966_v51  ;;  %684 = vmatprep.subr.bf16.mxu0 %v3968_v52 }
 0x10a   :  { %673 = vmatprep.mubr.bf16.mxu1 %v3852_v38  ;;  %714 = vmatprep.mubr.bf16.mxu0 %v3852_v38 }
 0x10c   :  { %644 = vmatpush1.bf16.msra.mxu1 %v3972_v53  ;;  %685 = vmatpush1.bf16.msra.mxu0 %v3974_v54 }
 0x10d   :  { %645 = vmatprep.subr.bf16.mxu1 %v3978_v55  ;;  %686 = vmatprep.subr.bf16.mxu0 %v3980_v56 }
 0x110   :  { %646 = vmatpush1.bf16.msra.mxu1 %v3986_v57  ;;  %687 = vmatpush1.bf16.msra.mxu0 %v3988_v58 }
 0x111   :  { %647 = vmatprep.subr.bf16.mxu1 %v3992_v59  ;;  %688 = vmatprep.subr.bf16.mxu0 %v3994_v60 }
 0x114   :  { %648 = vmatpush1.bf16.msra.mxu1 %v3998_v61  ;;  %689 = vmatpush1.bf16.msra.mxu0 %v4000_v62 }
 0x115   :  { %649 = vmatprep.subr.bf16.mxu1 %v4004_v63  ;;  %690 = vmatprep.subr.bf16.mxu0 %v4006_v1 }
 0x118   :  { %650 = vmatpush1.bf16.msra.mxu1 %v4010_v2  ;;  %691 = vmatpush1.bf16.msra.mxu0 %v4012_v3 }
 0x119   :  { %651 = vmatprep.subr.bf16.mxu1 %v4016_v4  ;;  %692 = vmatprep.subr.bf16.mxu0 %v4018_v5 }
 0x11c   :  { %652 = vmatpush1.bf16.msra.mxu1 %v4022_v6  ;;  %693 = vmatpush1.bf16.msra.mxu0 %v4024_v7 }
 0x11d   :  { %653 = vmatprep.subr.bf16.mxu1 %v4028_v8  ;;  %694 = vmatprep.subr.bf16.mxu0 %v4030_v9 }
 0x120   :  { %654 = vmatpush1.bf16.msra.mxu1 %v4034_v10  ;;  %695 = vmatpush1.bf16.msra.mxu0 %v4036_v11 }
 0x121   :  { %655 = vmatprep.subr.bf16.mxu1 %v4040_v12  ;;  %696 = vmatprep.subr.bf16.mxu0 %v4042_v13 }
 0x124   :  { %656 = vmatpush1.bf16.msra.mxu1 %v4046_v14  ;;  %697 = vmatpush1.bf16.msra.mxu0 %v4048_v15 }
 0x125   :  { %949 = vmatprep.subr.bf16.mxu1 %v3951_v36  ;;  %990 = vmatprep.subr.bf16.mxu0 %v3953_v37 }
 0x127   :  { %674 = vmatmul.mubr.bf16.vlgmr.msra.gmra.mrb[4].mxu1 %v448_v17  ;;  %715 = vmatmul.mubr.bf16.vlgmr.msra.gmra.mrb[8].mxu0 %v448_v17 }
 0x128   :  { %950 = vmatpush1.bf16.msra.mxu1 %v3962_v48  ;;  %991 = vmatpush1.bf16.msra.mxu0 %v3964_v49 }
 0x129   :  { %951 = vmatprep.subr.bf16.mxu1 %v3966_v51  ;;  %992 = vmatprep.subr.bf16.mxu0 %v3968_v52 }
 0x12a   :  { %981 = vmatprep.mubr.bf16.mxu1 %v3852_v38  ;;  %1022 = vmatprep.mubr.bf16.mxu0 %v3852_v38 }
 0x12c   :  { %952 = vmatpush1.bf16.msra.mxu1 %v3972_v53  ;;  %993 = vmatpush1.bf16.msra.mxu0 %v3974_v54 }
 0x12d   :  { %953 = vmatprep.subr.bf16.mxu1 %v3978_v55  ;;  %994 = vmatprep.subr.bf16.mxu0 %v3980_v56 }
 0x130   :  { %954 = vmatpush1.bf16.msra.mxu1 %v3986_v57  ;;  %995 = vmatpush1.bf16.msra.mxu0 %v3988_v58 }
 0x131   :  { %955 = vmatprep.subr.bf16.mxu1 %v3992_v59  ;;  %996 = vmatprep.subr.bf16.mxu0 %v3994_v60 }
 0x134   :  { %956 = vmatpush1.bf16.msra.mxu1 %v3998_v61  ;;  %997 = vmatpush1.bf16.msra.mxu0 %v4000_v62 }
 0x135   :  { %957 = vmatprep.subr.bf16.mxu1 %v4004_v63  ;;  %998 = vmatprep.subr.bf16.mxu0 %v4006_v1 }
 0x138   :  { %958 = vmatpush1.bf16.msra.mxu1 %v4010_v2  ;;  %999 = vmatpush1.bf16.msra.mxu0 %v4012_v3 }
 0x139   :  { %959 = vmatprep.subr.bf16.mxu1 %v4016_v4  ;;  %1000 = vmatprep.subr.bf16.mxu0 %v4018_v5 }
 0x13c   :  { %960 = vmatpush1.bf16.msra.mxu1 %v4022_v6  ;;  %1001 = vmatpush1.bf16.msra.mxu0 %v4024_v7 }
 0x13d   :  { %961 = vmatprep.subr.bf16.mxu1 %v4028_v8  ;;  %1002 = vmatprep.subr.bf16.mxu0 %v4030_v9 }
 0x140   :  { %962 = vmatpush1.bf16.msra.mxu1 %v4034_v10  ;;  %1003 = vmatpush1.bf16.msra.mxu0 %v4036_v11 }
 0x141   :  { %963 = vmatprep.subr.bf16.mxu1 %v4040_v12  ;;  %1004 = vmatprep.subr.bf16.mxu0 %v4042_v13 }
 0x144   :  { %964 = vmatpush1.bf16.msra.mxu1 %v4046_v14  ;;  %1005 = vmatpush1.bf16.msra.mxu0 %v4048_v15 }
 0x145   :  { %1275 = vmatprep.subr.bf16.mxu1 %v3951_v36  ;;  %1316 = vmatprep.subr.bf16.mxu0 %v3953_v37 }
 0x1da   :  { %v382_v29 = vpop.f32.mrb[0].mxu1  ;;  %v425_v30 = vpop.f32.mrb[4].mxu0 }
 0x1db   :  { %v383_v31 = vadd.f32 %v382_v29, %v171_v25  ;;  %v426_v32 = vadd.f32 %v425_v30, %v179_v26  ;;  %v384_v33 = vpop.f32.mrb[1].mxu1  ;;  %v427_v34 = vpop.f32.mrb[5].mxu0 }
 0x1dc   :  { %v385_v35 = vadd.f32 %v384_v33, %v175_v27  ;;  %v428_v39 = vadd.f32 %v427_v34, %v183_v28  ;;  %v386_v40 = vpop.f32.mrb[2].mxu1  ;;  %v429_v41 = vpop.f32.mrb[6].mxu0 }
 0x1dd   :  { %434 = vst [vmem:[#allocation2] sm:$0xff] %v383_v31  ;;  %436 = vst [vmem:[#allocation2 + $0x10] sm:$0xff] %v426_v32  ;;  %v387_v42 = vadd.f32 %v386_v40, %v171_v25  ;;  %v430_v43 = vadd.f32 %v429_v41, %v179_v26  ;;  %v388_v44 = vpop.f32.mrb[3].mxu1  ;;  %v431_v45 = vpop.f32.mrb[7].mxu0 }
 0x1de   :  { %435 = vst [vmem:[#allocation2 + $0x8] sm:$0xff] %v385_v35  ;;  %437 = vst [vmem:[#allocation2 + $0x18] sm:$0xff] %v428_v39  ;;  %v389_v46 = vadd.f32 %v388_v44, %v175_v27  ;;  %v432_v47 = vadd.f32 %v431_v45, %v183_v28  ;;  %v443_v44 = vld [vmem:[%s4444_s2] sm:$0x3] }
 0x1df   :  { %438 = vst [vmem:[#allocation2 + $0x20] sm:$0xff] %v387_v42  ;;  %440 = vst [vmem:[#allocation2 + $0x30] sm:$0xff] %v430_v43 }
 0x1e0   :  { %439 = vst [vmem:[#allocation2 + $0x28] sm:$0xff] %v389_v46  ;;  %441 = vst [vmem:[#allocation2 + $0x38] sm:$0xff] %v432_v47 }
 0x1e4   :  { %v444_v50 = vld [vmem:[#allocation2] sm:$0x3]  ;;  %v446_v27 = vld [vmem:[#allocation2 + $0x10] sm:$0x3] }
 0x1e5   :  { %v445_v19 = vld [vmem:[#allocation2 + $0x8] sm:$0x3]  ;;  %v447_v31 = vld [vmem:[#allocation2 + $0x18] sm:$0x3] }
 0x1fa   :  { %v675_v16 = vpop.f32.mrb[4].mxu1  ;;  %v716_v17 = vpop.f32.mrb[8].mxu0 }
 0x1fb   :  { %v723_v18 = vadd.f32 %v675_v16, %v444_v50  ;;  %v677_v20 = vpop.f32.mrb[5].mxu1  ;;  %v718_v21 = vpop.f32.mrb[9].mxu0  ;;  %v725_v28 = vadd.f32 %v716_v17, %v446_v27 }
 0x1fc   :  { %v724_v22 = vadd.f32 %v677_v20, %v445_v19  ;;  %v679_v23 = vpop.f32.mrb[6].mxu1  ;;  %v720_v24 = vpop.f32.mrb[10].mxu0  ;;  %v726_v32 = vadd.f32 %v718_v21, %v447_v31  ;;  %v753_v31 = vld [vmem:[#allocation2 + $0x8] sm:$0xc] }
 0x1fd   :  { %v3216_v25 = vmul.f32 -1.442695, %v723_v18  ;;  %v680_v26 = vpop.f32.mrb[7].mxu1  ;;  %v721_v29 = vpop.f32.mrb[11].mxu0  ;;  %v3218_v33 = vmul.f32 -1.442695, %v725_v28 }
 0x1fe   :  { %v3217_v30 = vmul.f32 -1.442695, %v724_v22  ;;  %v752_v26 = vld [vmem:[#allocation2] sm:$0xc] }
 0x1ff   :  { %3670 = vpow2.f32 %v3216_v25 }
 0x200   :  { %3672 = vpow2.f32 %v3217_v30 }
 0x201   :  { %3674 = vtanh.f32 %v726_v32 }
 0x202   :  { %3676 = vpow2.f32 %v3218_v33 }
 0x209   :  { %v3671_v34 = vpop.eup %3670 }
 0x20a   :  { %v736_v35 = vadd.f32 1.0, %v3671_v34  ;;  %v3673_v39 = vpop.eup %3672 }
 0x20b   :  { %v737_v40 = vadd.f32 1.0, %v3673_v39  ;;  %v3675_v41 = vpop.eup %3674 }
 0x20c   :  { %3678 = vrcp.f32 %v736_v35  ;;  %v3677_v42 = vpop.eup %3676 }
 0x20d   :  { %3680 = vrcp.f32 %v737_v40  ;;  %v738_v47 = vadd.f32 1.0, %v3677_v42  ;;  %v755_v42 = vld [vmem:[#allocation2 + $0x18] sm:$0xc] }
 0x20f   :  { %3682 = vrcp.f32 %v738_v47 }
 0x216   :  { %v3679_v43 = vpop.eup %3678 }
 0x217   :  { %v747_v45 = vmul.f32 %v3679_v43, %v3675_v41  ;;  %v3681_v46 = vpop.eup %3680 }
 0x218   :  { %v746_v50 = vmul.f32 %v3681_v46, %v443_v44 }
 0x219   :  { %v3683_v17 = vpop.eup %3682 }
 0x21a   :  { %v4099_v16 = vadd.f32 %v747_v45, %v746_v50 }
 0x21c   :  { %3684 = vtanh.f32 %v4099_v16 }
 0x226   :  { %v3685_v18 = vpop.eup %3684 }
 0x227   :  { %v750_v19 = vmul.f32 %v3685_v18, %v3683_v17 }
 0x229   :  { %751 = vst [vmem:[#allocation3] sm:$0x3] %v750_v19  ;;  %v756_v20 = vpack.c.bf16 %v750_v19, %v750_v19 }
 0x22b   :  { %982 = vmatmul.mubr.bf16.vlgmr.msra.gmra.mrb[8].mxu1 %v756_v20  ;;  %1023 = vmatmul.mubr.bf16.vlgmr.msra.gmra.mrb[12].mxu0 %v756_v20  ;;  %v1067_v20 = vrot.slane %v4099_v16, 6 }
 0x22c   :  { %1276 = vmatpush1.bf16.msra.mxu1 %v3962_v48  ;;  %1317 = vmatpush1.bf16.msra.mxu0 %v3964_v49 }
 0x22d   :  { %1277 = vmatprep.subr.bf16.mxu1 %v3966_v51  ;;  %1318 = vmatprep.subr.bf16.mxu0 %v3968_v52 }
 0x22e   :  { %1307 = vmatprep.mubr.bf16.mxu1 %v3852_v38  ;;  %1348 = vmatprep.mubr.bf16.mxu0 %v3852_v38 }
 0x230   :  { %1278 = vmatpush1.bf16.msra.mxu1 %v3972_v53  ;;  %1319 = vmatpush1.bf16.msra.mxu0 %v3974_v54 }
 0x231   :  { %1279 = vmatprep.subr.bf16.mxu1 %v3978_v55  ;;  %1320 = vmatprep.subr.bf16.mxu0 %v3980_v56 }
 0x234   :  { %1280 = vmatpush1.bf16.msra.mxu1 %v3986_v57  ;;  %1321 = vmatpush1.bf16.msra.mxu0 %v3988_v58 }
 0x235   :  { %1281 = vmatprep.subr.bf16.mxu1 %v3992_v59  ;;  %1322 = vmatprep.subr.bf16.mxu0 %v3994_v60 }
 0x238   :  { %1282 = vmatpush1.bf16.msra.mxu1 %v3998_v61  ;;  %1323 = vmatpush1.bf16.msra.mxu0 %v4000_v62 }
 0x239   :  { %1283 = vmatprep.subr.bf16.mxu1 %v4004_v63  ;;  %1324 = vmatprep.subr.bf16.mxu0 %v4006_v1 }
 0x23c   :  { %1284 = vmatpush1.bf16.msra.mxu1 %v4010_v2  ;;  %1325 = vmatpush1.bf16.msra.mxu0 %v4012_v3 }
 0x23d   :  { %1285 = vmatprep.subr.bf16.mxu1 %v4016_v4  ;;  %1326 = vmatprep.subr.bf16.mxu0 %v4018_v5 }
 0x240   :  { %1286 = vmatpush1.bf16.msra.mxu1 %v4022_v6  ;;  %1327 = vmatpush1.bf16.msra.mxu0 %v4024_v7 }
 0x241   :  { %1287 = vmatprep.subr.bf16.mxu1 %v4028_v8  ;;  %1328 = vmatprep.subr.bf16.mxu0 %v4030_v9 }
 0x244   :  { %1288 = vmatpush1.bf16.msra.mxu1 %v4034_v10  ;;  %1329 = vmatpush1.bf16.msra.mxu0 %v4036_v11 }
 0x245   :  { %1289 = vmatprep.subr.bf16.mxu1 %v4040_v12  ;;  %1330 = vmatprep.subr.bf16.mxu0 %v4042_v13 }
 0x248   :  { %1290 = vmatpush1.bf16.msra.mxu1 %v4046_v14  ;;  %1331 = vmatpush1.bf16.msra.mxu0 %v4048_v15 }
 0x249   :  { %1601 = vmatprep.subr.bf16.mxu1 %v3951_v36  ;;  %1642 = vmatprep.subr.bf16.mxu0 %v3953_v37  ;;  %v754_v37 = vld [vmem:[#allocation2 + $0x10] sm:$0xc] }
 0x2fe   :  { %v983_v21 = vpop.f32.mrb[8].mxu1  ;;  %v1024_v22 = vpop.f32.mrb[12].mxu0 }
 0x2ff   :  { %v1035_v23 = vrot.slane %v983_v21, 6  ;;  %v985_v24 = vpop.f32.mrb[9].mxu1  ;;  %v1026_v25 = vpop.f32.mrb[13].mxu0  ;;  %v1037_v36 = vrot.slane %v1024_v22, 6 }
 0x300   :  { %v1036_v29 = vrot.slane %v985_v24, 6  ;;  %v987_v30 = vpop.f32.mrb[10].mxu1  ;;  %v1028_v27 = vpop.f32.mrb[14].mxu0  ;;  %v1038_v40 = vrot.slane %v1026_v25, 6 }
 0x301   :  { %v1043_v28 = vadd.f32 %v1035_v23, %v752_v26  ;;  %v988_v32 = vpop.f32.mrb[11].mxu1  ;;  %v1029_v33 = vpop.f32.mrb[15].mxu0  ;;  %v1045_v41 = vadd.f32 %v1037_v36, %v754_v37 }
 0x302   :  { %v1044_v34 = vadd.f32 %v1036_v29, %v753_v31  ;;  %v1046_v43 = vadd.f32 %v1038_v40, %v755_v42  ;;  %v4178_v42 = vld [vmem:[#allocation6 + $0x4] ss:$16 sps:$4 sm:$0xff]  }
 0x303   :  { %v3251_v35 = vmul.f32 -1.442695, %v1043_v28  ;;  %v3253_v44 = vmul.f32 -1.442695, %v1045_v41 }
 0x304   :  { %v3252_v39 = vmul.f32 -1.442695, %v1044_v34 }
 0x305   :  { %3686 = vpow2.f32 %v3251_v35 }
 0x306   :  { %3688 = vpow2.f32 %v3252_v39 }
 0x307   :  { %3690 = vtanh.f32 %v1046_v43  ;;  %v4180_v43 = vld [vmem:[#allocation6 + $0xc] ss:$16 sps:$4 sm:$0xff]  }
 0x308   :  { %3692 = vpow2.f32 %v3253_v44  ;;  %v4182_v44 = vld [vmem:[#allocation6] ss:$16 sps:$4 sm:$0xff]  }
 0x30f   :  { %v3687_v45 = vpop.eup %3686 }
 0x310   :  { %v1056_v46 = vadd.f32 1.0, %v3687_v45  ;;  %v3689_v47 = vpop.eup %3688  ;;  %v4184_v45 = vld [vmem:[#allocation6 + $0x8] ss:$16 sps:$4 sm:$0xff]  }
 0x311   :  { %v1057_v50 = vadd.f32 1.0, %v3689_v47  ;;  %v3691_v17 = vpop.eup %3690  ;;  %v4192_v47 = vld [vmem:[#allocation6 + $0x2c] ss:$16 sps:$4 sm:$0xff]  }
 0x312   :  { %3694 = vrcp.f32 %v1056_v46  ;;  %v3693_v18 = vpop.eup %3692  ;;  %v4190_v46 = vld [vmem:[#allocation6 + $0x24] ss:$16 sps:$4 sm:$0xff]  }
 0x313   :  { %3696 = vrcp.f32 %v1057_v50  ;;  %v1058_v23 = vadd.f32 1.0, %v3693_v18  ;;  %v4194_v50 = vld [vmem:[#allocation6 + $0x20] ss:$16 sps:$4 sm:$0xff]   ;;  %v4202_v18 = vld [vmem:[#allocation6 + $0x44] ss:$16 sps:$4 sm:$0xff]  }
 0x315   :  { %3698 = vrcp.f32 %v1058_v23  ;;  %v4216_v23 = vld [vmem:[#allocation6 + $0x6c] ss:$16 sps:$4 sm:$0xff]  }
 0x31c   :  { %v3695_v19 = vpop.eup %3694 }
 0x31d   :  { %v1070_v21 = vmul.f32 %v3695_v19, %v3691_v17  ;;  %v3697_v22 = vpop.eup %3696  ;;  %v4196_v17 = vld [vmem:[#allocation6 + $0x28] ss:$16 sps:$4 sm:$0xff]   ;;  %v4204_v19 = vld [vmem:[#allocation6 + $0x4c] ss:$16 sps:$4 sm:$0xff]  }
 0x31e   :  { %v1069_v24 = vmul.f32 %v3697_v22, %v1067_v20  ;;  %v4206_v20 = vld [vmem:[#allocation6 + $0x40] ss:$16 sps:$4 sm:$0xff]   ;;  %v4214_v22 = vld [vmem:[#allocation6 + $0x64] ss:$16 sps:$4 sm:$0xff]  }
 0x31f   :  { %v3699_v26 = vpop.eup %3698 }
 0x320   :  { %v4137_v25 = vadd.f32 %v1070_v21, %v1069_v24  ;;  %v4208_v21 = vld [vmem:[#allocation6 + $0x48] ss:$16 sps:$4 sm:$0xff]   ;;  %v4218_v24 = vld [vmem:[#allocation6 + $0x60] ss:$16 sps:$4 sm:$0xff]  }
 0x322   :  { %3700 = vtanh.f32 %v4137_v25  ;;  %v1393_v16 = vrot.slane %v4137_v25, 6  ;;  %v4220_v25 = vld [vmem:[#allocation6 + $0x68] ss:$16 sps:$4 sm:$0xff]  }
 0x32c   :  { %v3701_v29 = vpop.eup %3700 }
 0x32d   :  { %v1073_v30 = vmul.f32 %v3701_v29, %v3699_v26  ;;  %v4226_v26 = vld [vmem:[#allocation6 + $0x84] ss:$16 sps:$4 sm:$0xff]   ;;  %v4228_v29 = vld [vmem:[#allocation6 + $0x8c] ss:$16 sps:$4 sm:$0xff]  }
 0x32f   :  { %1074 = vst [vmem:[#allocation3] sm:$0xc] %v1073_v30  ;;  %v1079_v27 = vpack.c.bf16 %v1073_v30, %v1073_v30  ;;  %v4230_v30 = vld [vmem:[#allocation6 + $0x80] ss:$16 sps:$4 sm:$0xff]  }
 0x331   :  { %v1113_v28 = vrot.slane %v1079_v27, 1  ;;  %v4232_v27 = vld [vmem:[#allocation6 + $0x88] ss:$16 sps:$4 sm:$0xff]  }
 0x333   :  { %1308 = vmatmul.mubr.bf16.vlgmr.msra.gmra.mrb[12].mxu1 %v1113_v28  ;;  %1349 = vmatmul.mubr.bf16.vlgmr.msra.gmra.mrb[16].mxu0 %v1113_v28  ;;  %v4236_v28 = vld [vmem:[#allocation6 + $0xa4] ss:$16 sps:$4 sm:$0xff]  }
 0x334   :  { %1602 = vmatpush1.bf16.msra.mxu1 %v3962_v48  ;;  %1643 = vmatpush1.bf16.msra.mxu0 %v3964_v49 }
 0x335   :  { %1603 = vmatprep.subr.bf16.mxu1 %v3966_v51  ;;  %1644 = vmatprep.subr.bf16.mxu0 %v3968_v52 }
 0x336   :  { %1633 = vmatprep.mubr.bf16.mxu1 %v3852_v38  ;;  %1674 = vmatprep.mubr.bf16.mxu0 %v3852_v38 }
 0x338   :  { %1604 = vmatpush1.bf16.msra.mxu1 %v3972_v53  ;;  %1645 = vmatpush1.bf16.msra.mxu0 %v3974_v54  ;;  %v1075_v54 = vld [vmem:[#allocation2] sm:$0x30] }
 0x339   :  { %1605 = vmatprep.subr.bf16.mxu1 %v3978_v55  ;;  %1646 = vmatprep.subr.bf16.mxu0 %v3980_v56 }
 0x33c   :  { %1606 = vmatpush1.bf16.msra.mxu1 %v3986_v57  ;;  %1647 = vmatpush1.bf16.msra.mxu0 %v3988_v58 }
 0x33d   :  { %1607 = vmatprep.subr.bf16.mxu1 %v3992_v59  ;;  %1648 = vmatprep.subr.bf16.mxu0 %v3994_v60  ;;  %v1076_v59 = vld [vmem:[#allocation2 + $0x8] sm:$0x30] }
 0x340   :  { %1608 = vmatpush1.bf16.msra.mxu1 %v3998_v61  ;;  %1649 = vmatpush1.bf16.msra.mxu0 %v4000_v62 }
 0x341   :  { %1609 = vmatprep.subr.bf16.mxu1 %v4004_v63  ;;  %1650 = vmatprep.subr.bf16.mxu0 %v4006_v1 }
 0x344   :  { %1610 = vmatpush1.bf16.msra.mxu1 %v4010_v2  ;;  %1651 = vmatpush1.bf16.msra.mxu0 %v4012_v3  ;;  %v1077_v3 = vld [vmem:[#allocation2 + $0x10] sm:$0x30] }
 0x345   :  { %1611 = vmatprep.subr.bf16.mxu1 %v4016_v4  ;;  %1652 = vmatprep.subr.bf16.mxu0 %v4018_v5 }
 0x348   :  { %1612 = vmatpush1.bf16.msra.mxu1 %v4022_v6  ;;  %1653 = vmatpush1.bf16.msra.mxu0 %v4024_v7  ;;  %v1078_v6 = vld [vmem:[#allocation2 + $0x18] sm:$0x30] }
 0x349   :  { %1613 = vmatprep.subr.bf16.mxu1 %v4028_v8  ;;  %1654 = vmatprep.subr.bf16.mxu0 %v4030_v9 }
 0x34c   :  { %1614 = vmatpush1.bf16.msra.mxu1 %v4034_v10  ;;  %1655 = vmatpush1.bf16.msra.mxu0 %v4036_v11 }
 0x34d   :  { %1615 = vmatprep.subr.bf16.mxu1 %v4040_v12  ;;  %1656 = vmatprep.subr.bf16.mxu0 %v4042_v13 }
 0x350   :  { %1616 = vmatpush1.bf16.msra.mxu1 %v4046_v14  ;;  %1657 = vmatpush1.bf16.msra.mxu0 %v4048_v15 }
 0x351   :  { %1927 = vmatprep.subr.bf16.mxu1 %v4178_v42  ;;  %1968 = vmatprep.subr.bf16.mxu0 %v4180_v43 }
 0x406   :  { %v1309_v48 = vpop.f32.mrb[12].mxu1  ;;  %v1350_v49 = vpop.f32.mrb[16].mxu0 }
 0x407   :  { %v1361_v51 = vrot.slane %v1309_v48, 4  ;;  %v1311_v52 = vpop.f32.mrb[13].mxu1  ;;  %v1352_v53 = vpop.f32.mrb[17].mxu0  ;;  %v1363_v2 = vrot.slane %v1350_v49, 4  ;;  %v4238_v48 = vld [vmem:[#allocation6 + $0xac] ss:$16 sps:$4 sm:$0xff]  }
 0x408   :  { %v1362_v55 = vrot.slane %v1311_v52, 4  ;;  %v1313_v56 = vpop.f32.mrb[14].mxu1  ;;  %v1354_v57 = vpop.f32.mrb[18].mxu0  ;;  %v1364_v4 = vrot.slane %v1352_v53, 4  ;;  %v4242_v49 = vld [vmem:[#allocation6 + $0xa0] ss:$16 sps:$4 sm:$0xff]  }
 0x409   :  { %v1369_v58 = vadd.f32 %v1361_v51, %v1075_v54  ;;  %v1314_v60 = vpop.f32.mrb[15].mxu1  ;;  %v1355_v61 = vpop.f32.mrb[19].mxu0  ;;  %v1371_v5 = vadd.f32 %v1363_v2, %v1077_v3  ;;  %v4244_v51 = vld [vmem:[#allocation6 + $0xa8] ss:$16 sps:$4 sm:$0xff]   ;;  %v4248_v52 = vld [vmem:[#allocation6 + $0xc4] ss:$16 sps:$4 sm:$0xff]  }
 0x40a   :  { %v1370_v62 = vadd.f32 %v1362_v55, %v1076_v59  ;;  %v1372_v7 = vadd.f32 %v1364_v4, %v1078_v6  ;;  %v4250_v53 = vld [vmem:[#allocation6 + $0xcc] ss:$16 sps:$4 sm:$0xff]   ;;  %v4254_v54 = vld [vmem:[#allocation6 + $0xc0] ss:$16 sps:$4 sm:$0xff]   ;;  %v4256_v55 = vld [vmem:[#allocation6 + $0xc8] ss:$16 sps:$4 sm:$0xff]  }
 0x40b   :  { %v3286_v63 = vmul.f32 -1.442695, %v1369_v58  ;;  %v3288_v8 = vmul.f32 -1.442695, %v1371_v5  ;;  %v4260_v56 = vld [vmem:[#allocation6 + $0xe4] ss:$16 sps:$4 sm:$0xff]  }
 0x40c   :  { %v3287_v1 = vmul.f32 -1.442695, %v1370_v62  ;;  %v4262_v57 = vld [vmem:[#allocation6 + $0xec] ss:$16 sps:$4 sm:$0xff]   ;;  %v4266_v58 = vld [vmem:[#allocation6 + $0xe0] ss:$16 sps:$4 sm:$0xff]  }
 0x40d   :  { %3702 = vpow2.f32 %v3286_v63  ;;  %v4268_v59 = vld [vmem:[#allocation6 + $0xe8] ss:$16 sps:$4 sm:$0xff]   ;;  %v1401_v2 = vld [vmem:[#allocation2] sm:$0xc0] }
 0x40e   :  { %3704 = vpow2.f32 %v3287_v1 }
 0x40f   :  { %3706 = vtanh.f32 %v1372_v7  ;;  %v1402_v7 = vld [vmem:[#allocation2 + $0x8] sm:$0xc0] }
 0x410   :  { %3708 = vpow2.f32 %v3288_v8 }
 0x417   :  { %v3703_v9 = vpop.eup %3702 }
 0x418   :  { %v1382_v10 = vadd.f32 1.0, %v3703_v9  ;;  %v3705_v11 = vpop.eup %3704 }
 0x419   :  { %v1383_v12 = vadd.f32 1.0, %v3705_v11  ;;  %v3707_v13 = vpop.eup %3706 }
 0x41a   :  { %3710 = vrcp.f32 %v1382_v10  ;;  %v3709_v14 = vpop.eup %3708 }
 0x41b   :  { %3712 = vrcp.f32 %v1383_v12  ;;  %v1384_v33 = vadd.f32 1.0, %v3709_v14  ;;  %v1403_v14 = vld [vmem:[#allocation2 + $0x10] sm:$0xc0] }
 0x41d   :  { %3714 = vrcp.f32 %v1384_v33 }
 0x424   :  { %v3711_v15 = vpop.eup %3710 }
 0x425   :  { %v1396_v31 = vmul.f32 %v3711_v15, %v3707_v13  ;;  %v3713_v32 = vpop.eup %3712 }
 0x426   :  { %v1395_v34 = vmul.f32 %v3713_v32, %v1393_v16 }
 0x427   :  { %v3715_v39 = vpop.eup %3714 }
 0x428   :  { %v4173_v35 = vadd.f32 %v1396_v31, %v1395_v34  ;;  %v1404_v31 = vld [vmem:[#allocation2 + $0x18] sm:$0xc0] }
 0x42a   :  { %3716 = vtanh.f32 %v4173_v35 }
 0x434   :  { %v3717_v36 = vpop.eup %3716 }
 0x435   :  { %v1399_v37 = vmul.f32 %v3717_v36, %v3715_v39 }
 0x437   :  { %1400 = vst [vmem:[#allocation3] sm:$0x30] %v1399_v37  ;;  %v1405_v40 = vpack.c.bf16 %v1399_v37, %v1399_v37 }
 0x439   :  { %v1439_v41 = vrot.slane %v1405_v40, 2 }
 0x43b   :  { %1634 = vmatmul.mubr.bf16.vlgmr.msra.gmra.mrb[16].mxu1 %v1439_v41  ;;  %1675 = vmatmul.mubr.bf16.vlgmr.msra.gmra.mrb[20].mxu0 %v1439_v41 }
 0x43c   :  { %1959 = vmatprep.mubr.bf16.mxu1 %v3852_v38  ;;  %2000 = vmatprep.mubr.bf16.mxu0 %v3852_v38 }
 0x43d   :  { %1928 = vmatpush1.bf16.msra.mxu1 %v4182_v44  ;;  %1969 = vmatpush1.bf16.msra.mxu0 %v4184_v45 }
 0x43e   :  { %1929 = vmatprep.subr.bf16.mxu1 %v4190_v46  ;;  %1970 = vmatprep.subr.bf16.mxu0 %v4192_v47 }
 0x441   :  { %1930 = vmatpush1.bf16.msra.mxu1 %v4194_v50  ;;  %1971 = vmatpush1.bf16.msra.mxu0 %v4196_v17 }
 0x442   :  { %1931 = vmatprep.subr.bf16.mxu1 %v4202_v18  ;;  %1972 = vmatprep.subr.bf16.mxu0 %v4204_v19 }
 0x445   :  { %1932 = vmatpush1.bf16.msra.mxu1 %v4206_v20  ;;  %1973 = vmatpush1.bf16.msra.mxu0 %v4208_v21 }
 0x446   :  { %1933 = vmatprep.subr.bf16.mxu1 %v4214_v22  ;;  %1974 = vmatprep.subr.bf16.mxu0 %v4216_v23 }
 0x449   :  { %1934 = vmatpush1.bf16.msra.mxu1 %v4218_v24  ;;  %1975 = vmatpush1.bf16.msra.mxu0 %v4220_v25 }
 0x44a   :  { %1935 = vmatprep.subr.bf16.mxu1 %v4226_v26  ;;  %1976 = vmatprep.subr.bf16.mxu0 %v4228_v29 }
 0x44d   :  { %1936 = vmatpush1.bf16.msra.mxu1 %v4230_v30  ;;  %1977 = vmatpush1.bf16.msra.mxu0 %v4232_v27 }
 0x44e   :  { %1937 = vmatprep.subr.bf16.mxu1 %v4236_v28  ;;  %1978 = vmatprep.subr.bf16.mxu0 %v4238_v48 }
 0x451   :  { %1938 = vmatpush1.bf16.msra.mxu1 %v4242_v49  ;;  %1979 = vmatpush1.bf16.msra.mxu0 %v4244_v51 }
 0x452   :  { %1939 = vmatprep.subr.bf16.mxu1 %v4248_v52  ;;  %1980 = vmatprep.subr.bf16.mxu0 %v4250_v53 }
 0x455   :  { %1940 = vmatpush1.bf16.msra.mxu1 %v4254_v54  ;;  %1981 = vmatpush1.bf16.msra.mxu0 %v4256_v55 }
 0x456   :  { %1941 = vmatprep.subr.bf16.mxu1 %v4260_v56  ;;  %1982 = vmatprep.subr.bf16.mxu0 %v4262_v57 }
 0x459   :  { %1942 = vmatpush1.bf16.msra.mxu1 %v4266_v58  ;;  %1983 = vmatpush1.bf16.msra.mxu0 %v4268_v59 }
 0x45a   :  { %2238 = vmatprep.subr.bf16.mxu1 %v4178_v42  ;;  %2279 = vmatprep.subr.bf16.mxu0 %v4180_v43 }
 0x50e   :  { %v1635_v60 = vpop.f32.mrb[16].mxu1  ;;  %v1676_v61 = vpop.f32.mrb[20].mxu0 }
 0x50f   :  { %v1687_v62 = vrot.slane %v1635_v60, 2  ;;  %v1637_v63 = vpop.f32.mrb[17].mxu1  ;;  %v1678_v1 = vpop.f32.mrb[21].mxu0  ;;  %v1689_v13 = vrot.slane %v1676_v61, 2  ;;  %v1719_v61 = vrot.slane %v4173_v35, 6 }
 0x510   :  { %v1688_v3 = vrot.slane %v1637_v63, 2  ;;  %v1639_v4 = vpop.f32.mrb[18].mxu1  ;;  %v1680_v5 = vpop.f32.mrb[22].mxu0  ;;  %v1690_v15 = vrot.slane %v1678_v1, 2  ;;  %v1727_v35 = vld [vmem:[#allocation2 + $0x20] sm:$0x3] }
 0x511   :  { %v1695_v6 = vadd.f32 %v1687_v62, %v1401_v2  ;;  %v1640_v8 = vpop.f32.mrb[19].mxu1  ;;  %v1681_v9 = vpop.f32.mrb[23].mxu0  ;;  %v1697_v16 = vadd.f32 %v1689_v13, %v1403_v14 }
 0x512   :  { %v1696_v10 = vadd.f32 %v1688_v3, %v1402_v7  ;;  %v1698_v32 = vadd.f32 %v1690_v15, %v1404_v31 }
 0x513   :  { %v3321_v11 = vmul.f32 -1.442695, %v1695_v6  ;;  %v3323_v33 = vmul.f32 -1.442695, %v1697_v16 }
 0x514   :  { %v3322_v12 = vmul.f32 -1.442695, %v1696_v10 }
 0x515   :  { %3718 = vpow2.f32 %v3321_v11 }
 0x516   :  { %3720 = vpow2.f32 %v3322_v12  ;;  %v1728_v12 = vld [vmem:[#allocation2 + $0x28] sm:$0x3] }
 0x517   :  { %3722 = vtanh.f32 %v1698_v32 }
 0x518   :  { %3724 = vpow2.f32 %v3323_v33 }
 0x51f   :  { %v3719_v34 = vpop.eup %3718 }
 0x520   :  { %v1708_v39 = vadd.f32 1.0, %v3719_v34  ;;  %v3721_v36 = vpop.eup %3720 }
 0x521   :  { %v1709_v37 = vadd.f32 1.0, %v3721_v36  ;;  %v3723_v40 = vpop.eup %3722  ;;  %v1729_v36 = vld [vmem:[#allocation2 + $0x30] sm:$0x3] }
 0x522   :  { %3726 = vrcp.f32 %v1708_v39  ;;  %v3725_v41 = vpop.eup %3724 }
 0x523   :  { %3728 = vrcp.f32 %v1709_v37  ;;  %v1710_v1 = vadd.f32 1.0, %v3725_v41 }
 0x525   :  { %3730 = vrcp.f32 %v1710_v1 }
 0x52c   :  { %v3727_v60 = vpop.eup %3726 }
 0x52d   :  { %v1722_v62 = vmul.f32 %v3727_v60, %v3723_v40  ;;  %v3729_v63 = vpop.eup %3728  ;;  %v1730_v40 = vld [vmem:[#allocation2 + $0x38] sm:$0x3] }
 0x52e   :  { %v1721_v2 = vmul.f32 %v3729_v63, %v1719_v61 }
 0x52f   :  { %v3731_v4 = vpop.eup %3730 }
 0x530   :  { %v4277_v3 = vadd.f32 %v1722_v62, %v1721_v2 }
 0x532   :  { %3732 = vtanh.f32 %v4277_v3 }
 0x53c   :  { %v3733_v5 = vpop.eup %3732 }
 0x53d   :  { %v1725_v6 = vmul.f32 %v3733_v5, %v3731_v4 }
 0x53f   :  { %1726 = vst [vmem:[#allocation3] sm:$0xc0] %v1725_v6  ;;  %v1731_v7 = vpack.c.bf16 %v1725_v6, %v1725_v6  ;;  %v2033_v6 = vrot.slane %v4277_v3, 6 }
 0x541   :  { %v1765_v8 = vrot.slane %v1731_v7, 3 }
 0x543   :  { %1960 = vmatmul.mubr.bf16.vlgmr.msra.gmra.mrb[20].mxu1 %v1765_v8  ;;  %2001 = vmatmul.mubr.bf16.vlgmr.msra.gmra.mrb[24].mxu0 %v1765_v8 }
 0x544   :  { %2239 = vmatpush1.bf16.msra.mxu1 %v4182_v44  ;;  %2280 = vmatpush1.bf16.msra.mxu0 %v4184_v45 }
 0x545   :  { %2240 = vmatprep.subr.bf16.mxu1 %v4190_v46  ;;  %2281 = vmatprep.subr.bf16.mxu0 %v4192_v47 }
 0x546   :  { %2270 = vmatprep.mubr.bf16.mxu1 %v3852_v38  ;;  %2311 = vmatprep.mubr.bf16.mxu0 %v3852_v38 }
 0x548   :  { %2241 = vmatpush1.bf16.msra.mxu1 %v4194_v50  ;;  %2282 = vmatpush1.bf16.msra.mxu0 %v4196_v17 }
 0x549   :  { %2242 = vmatprep.subr.bf16.mxu1 %v4202_v18  ;;  %2283 = vmatprep.subr.bf16.mxu0 %v4204_v19 }
 0x54c   :  { %2243 = vmatpush1.bf16.msra.mxu1 %v4206_v20  ;;  %2284 = vmatpush1.bf16.msra.mxu0 %v4208_v21 }
 0x54d   :  { %2244 = vmatprep.subr.bf16.mxu1 %v4214_v22  ;;  %2285 = vmatprep.subr.bf16.mxu0 %v4216_v23 }
 0x550   :  { %2245 = vmatpush1.bf16.msra.mxu1 %v4218_v24  ;;  %2286 = vmatpush1.bf16.msra.mxu0 %v4220_v25 }
 0x551   :  { %2246 = vmatprep.subr.bf16.mxu1 %v4226_v26  ;;  %2287 = vmatprep.subr.bf16.mxu0 %v4228_v29 }
 0x554   :  { %2247 = vmatpush1.bf16.msra.mxu1 %v4230_v30  ;;  %2288 = vmatpush1.bf16.msra.mxu0 %v4232_v27 }
 0x555   :  { %2248 = vmatprep.subr.bf16.mxu1 %v4236_v28  ;;  %2289 = vmatprep.subr.bf16.mxu0 %v4238_v48 }
 0x558   :  { %2249 = vmatpush1.bf16.msra.mxu1 %v4242_v49  ;;  %2290 = vmatpush1.bf16.msra.mxu0 %v4244_v51 }
 0x559   :  { %2250 = vmatprep.subr.bf16.mxu1 %v4248_v52  ;;  %2291 = vmatprep.subr.bf16.mxu0 %v4250_v53 }
 0x55c   :  { %2251 = vmatpush1.bf16.msra.mxu1 %v4254_v54  ;;  %2292 = vmatpush1.bf16.msra.mxu0 %v4256_v55 }
 0x55d   :  { %2252 = vmatprep.subr.bf16.mxu1 %v4260_v56  ;;  %2293 = vmatprep.subr.bf16.mxu0 %v4262_v57 }
 0x560   :  { %2253 = vmatpush1.bf16.msra.mxu1 %v4266_v58  ;;  %2294 = vmatpush1.bf16.msra.mxu0 %v4268_v59 }
 0x561   :  { %2564 = vmatprep.subr.bf16.mxu1 %v4178_v42  ;;  %2605 = vmatprep.subr.bf16.mxu0 %v4180_v43 }
 0x616   :  { %v1961_v9 = vpop.f32.mrb[20].mxu1  ;;  %v2002_v10 = vpop.f32.mrb[24].mxu0 }
 0x617   :  { %v2009_v11 = vadd.f32 %v1961_v9, %v1727_v35  ;;  %v1963_v13 = vpop.f32.mrb[21].mxu1  ;;  %v2004_v14 = vpop.f32.mrb[25].mxu0  ;;  %v2011_v37 = vadd.f32 %v2002_v10, %v1729_v36 }
 0x618   :  { %v2010_v15 = vadd.f32 %v1963_v13, %v1728_v12  ;;  %v1965_v16 = vpop.f32.mrb[22].mxu1  ;;  %v2006_v31 = vpop.f32.mrb[26].mxu0  ;;  %v2012_v41 = vadd.f32 %v2004_v14, %v1730_v40  ;;  %v2042_v40 = vld [vmem:[#allocation2 + $0x28] sm:$0xc] }
 0x619   :  { %v3356_v32 = vmul.f32 -1.442695, %v2009_v11  ;;  %v1966_v33 = vpop.f32.mrb[23].mxu1  ;;  %v2007_v34 = vpop.f32.mrb[27].mxu0  ;;  %v3358_v60 = vmul.f32 -1.442695, %v2011_v37 }
 0x61a   :  { %v3357_v39 = vmul.f32 -1.442695, %v2010_v15  ;;  %v2041_v33 = vld [vmem:[#allocation2 + $0x20] sm:$0xc] }
 0x61b   :  { %3734 = vpow2.f32 %v3356_v32 }
 0x61c   :  { %3736 = vpow2.f32 %v3357_v39 }
 0x61d   :  { %3738 = vtanh.f32 %v2012_v41 }
 0x61e   :  { %3740 = vpow2.f32 %v3358_v60 }
 0x625   :  { %v3735_v61 = vpop.eup %3734 }
 0x626   :  { %v2022_v62 = vadd.f32 1.0, %v3735_v61  ;;  %v3737_v63 = vpop.eup %3736 }
 0x627   :  { %v2023_v1 = vadd.f32 1.0, %v3737_v63  ;;  %v3739_v2 = vpop.eup %3738 }
 0x628   :  { %3742 = vrcp.f32 %v2022_v62  ;;  %v3741_v4 = vpop.eup %3740 }
 0x629   :  { %3744 = vrcp.f32 %v2023_v1  ;;  %v2024_v35 = vadd.f32 1.0, %v3741_v4  ;;  %v2044_v4 = vld [vmem:[#allocation2 + $0x38] sm:$0xc] }
 0x62b   :  { %3746 = vrcp.f32 %v2024_v35 }
 0x632   :  { %v3743_v5 = vpop.eup %3742 }
 0x633   :  { %v2036_v7 = vmul.f32 %v3743_v5, %v3739_v2  ;;  %v3745_v8 = vpop.eup %3744 }
 0x634   :  { %v2035_v9 = vmul.f32 %v3745_v8, %v2033_v6 }
 0x635   :  { %v3747_v11 = vpop.eup %3746 }
 0x636   :  { %v4315_v10 = vadd.f32 %v2036_v7, %v2035_v9 }
 0x638   :  { %3748 = vtanh.f32 %v4315_v10 }
 0x642   :  { %v3749_v12 = vpop.eup %3748 }
 0x643   :  { %v2039_v13 = vmul.f32 %v3749_v12, %v3747_v11 }
 0x645   :  { %2040 = vst [vmem:[#allocation3 + $0x8] sm:$0x3] %v2039_v13  ;;  %v2045_v14 = vpack.c.bf16 %v2039_v13, %v2039_v13 }
 0x647   :  { %2271 = vmatmul.mubr.bf16.vlgmr.msra.gmra.mrb[24].mxu1 %v2045_v14  ;;  %2312 = vmatmul.mubr.bf16.vlgmr.msra.gmra.mrb[28].mxu0 %v2045_v14  ;;  %v2356_v14 = vrot.slane %v4315_v10, 6 }
 0x648   :  { %2565 = vmatpush1.bf16.msra.mxu1 %v4182_v44  ;;  %2606 = vmatpush1.bf16.msra.mxu0 %v4184_v45 }
 0x649   :  { %2566 = vmatprep.subr.bf16.mxu1 %v4190_v46  ;;  %2607 = vmatprep.subr.bf16.mxu0 %v4192_v47 }
 0x64a   :  { %2596 = vmatprep.mubr.bf16.mxu1 %v3852_v38  ;;  %2637 = vmatprep.mubr.bf16.mxu0 %v3852_v38 }
 0x64c   :  { %2567 = vmatpush1.bf16.msra.mxu1 %v4194_v50  ;;  %2608 = vmatpush1.bf16.msra.mxu0 %v4196_v17 }
 0x64d   :  { %2568 = vmatprep.subr.bf16.mxu1 %v4202_v18  ;;  %2609 = vmatprep.subr.bf16.mxu0 %v4204_v19 }
 0x650   :  { %2569 = vmatpush1.bf16.msra.mxu1 %v4206_v20  ;;  %2610 = vmatpush1.bf16.msra.mxu0 %v4208_v21 }
 0x651   :  { %2570 = vmatprep.subr.bf16.mxu1 %v4214_v22  ;;  %2611 = vmatprep.subr.bf16.mxu0 %v4216_v23 }
 0x654   :  { %2571 = vmatpush1.bf16.msra.mxu1 %v4218_v24  ;;  %2612 = vmatpush1.bf16.msra.mxu0 %v4220_v25 }
 0x655   :  { %2572 = vmatprep.subr.bf16.mxu1 %v4226_v26  ;;  %2613 = vmatprep.subr.bf16.mxu0 %v4228_v29 }
 0x658   :  { %2573 = vmatpush1.bf16.msra.mxu1 %v4230_v30  ;;  %2614 = vmatpush1.bf16.msra.mxu0 %v4232_v27 }
 0x659   :  { %2574 = vmatprep.subr.bf16.mxu1 %v4236_v28  ;;  %2615 = vmatprep.subr.bf16.mxu0 %v4238_v48 }
 0x65c   :  { %2575 = vmatpush1.bf16.msra.mxu1 %v4242_v49  ;;  %2616 = vmatpush1.bf16.msra.mxu0 %v4244_v51 }
 0x65d   :  { %2576 = vmatprep.subr.bf16.mxu1 %v4248_v52  ;;  %2617 = vmatprep.subr.bf16.mxu0 %v4250_v53 }
 0x660   :  { %2577 = vmatpush1.bf16.msra.mxu1 %v4254_v54  ;;  %2618 = vmatpush1.bf16.msra.mxu0 %v4256_v55 }
 0x661   :  { %2578 = vmatprep.subr.bf16.mxu1 %v4260_v56  ;;  %2619 = vmatprep.subr.bf16.mxu0 %v4262_v57 }
 0x664   :  { %2579 = vmatpush1.bf16.msra.mxu1 %v4266_v58  ;;  %2620 = vmatpush1.bf16.msra.mxu0 %v4268_v59 }
 0x665   :  { %2890 = vmatprep.subr.bf16.mxu1 %v4178_v42  ;;  %2931 = vmatprep.subr.bf16.mxu0 %v4180_v43  ;;  %v2043_v43 = vld [vmem:[#allocation2 + $0x30] sm:$0xc] }
 0x71a   :  { %v2272_v3 = vpop.f32.mrb[24].mxu1  ;;  %v2313_v15 = vpop.f32.mrb[28].mxu0 }
 0x71b   :  { %v2324_v16 = vrot.slane %v2272_v3, 6  ;;  %v2274_v31 = vpop.f32.mrb[25].mxu1  ;;  %v2315_v32 = vpop.f32.mrb[29].mxu0  ;;  %v2326_v42 = vrot.slane %v2313_v15, 6 }
 0x71c   :  { %v2325_v34 = vrot.slane %v2274_v31, 6  ;;  %v2276_v39 = vpop.f32.mrb[26].mxu1  ;;  %v2317_v36 = vpop.f32.mrb[30].mxu0  ;;  %v2327_v1 = vrot.slane %v2315_v32, 6 }
 0x71d   :  { %v2332_v37 = vadd.f32 %v2324_v16, %v2041_v33  ;;  %v2277_v41 = vpop.f32.mrb[27].mxu1  ;;  %v2318_v60 = vpop.f32.mrb[31].mxu0  ;;  %v2334_v2 = vadd.f32 %v2326_v42, %v2043_v43 }
 0x71e   :  { %v2333_v61 = vadd.f32 %v2325_v34, %v2042_v40  ;;  %v2335_v5 = vadd.f32 %v2327_v1, %v2044_v4  ;;  %v3663_v4 = vld [vmem:[%s4450_s8 + $0x8] sm:$0xff]  }
 0x71f   :  { %v3391_v62 = vmul.f32 -1.442695, %v2332_v37  ;;  %v3393_v6 = vmul.f32 -1.442695, %v2334_v2  ;;  %v3662_v2 = vld [vmem:[%s4450_s8] sm:$0xff]  }
 0x720   :  { %v3392_v63 = vmul.f32 -1.442695, %v2333_v61 }
 0x721   :  { %3750 = vpow2.f32 %v3391_v62 }
 0x722   :  { %3752 = vpow2.f32 %v3392_v63 }
 0x723   :  { %3754 = vtanh.f32 %v2335_v5  ;;  %v3664_v5 = vld [vmem:[%s4450_s8 + $0x10] sm:$0xff]  }
 0x724   :  { %3756 = vpow2.f32 %v3393_v6  ;;  %v3665_v6 = vld [vmem:[%s4450_s8 + $0x18] sm:$0xff]  }
 0x72b   :  { %v3751_v7 = vpop.eup %3750 }
 0x72c   :  { %v2345_v8 = vadd.f32 1.0, %v3751_v7  ;;  %v3753_v35 = vpop.eup %3752  ;;  %v3666_v7 = vld [vmem:[%s4450_s8 + $0x20] sm:$0xff]  }
 0x72d   :  { %v2346_v9 = vadd.f32 1.0, %v3753_v35  ;;  %v3755_v11 = vpop.eup %3754  ;;  %v3668_v35 = vld [vmem:[%s4450_s8 + $0x30] sm:$0xff]  }
 0x72e   :  { %3758 = vrcp.f32 %v2345_v8  ;;  %v3757_v12 = vpop.eup %3756  ;;  %v3667_v8 = vld [vmem:[%s4450_s8 + $0x28] sm:$0xff]  }
 0x72f   :  { %3760 = vrcp.f32 %v2346_v9  ;;  %v2347_v16 = vadd.f32 1.0, %v3757_v12  ;;  %v3669_v9 = vld [vmem:[%s4450_s8 + $0x38] sm:$0xff]  }
 0x731   :  { %3762 = vrcp.f32 %v2347_v16 }
 0x738   :  { %v3759_v13 = vpop.eup %3758 }
 0x739   :  { %v2359_v3 = vmul.f32 %v3759_v13, %v3755_v11  ;;  %v3761_v15 = vpop.eup %3760 }
 0x73a   :  { %v2358_v31 = vmul.f32 %v3761_v15, %v2356_v14  ;;  %v2690_v15 = vld [vmem:[#allocation2 + $0x20] sm:$0xc0] }
 0x73b   :  { %v3763_v33 = vpop.eup %3762 }
 0x73c   :  { %v4353_v32 = vadd.f32 %v2359_v3, %v2358_v31 }
 0x73e   :  { %3764 = vtanh.f32 %v4353_v32 }
 0x748   :  { %v3765_v34 = vpop.eup %3764 }
 0x749   :  { %v2362_v39 = vmul.f32 %v3765_v34, %v3763_v33  ;;  %v2691_v34 = vld [vmem:[#allocation2 + $0x28] sm:$0xc0] }
 0x74b   :  { %2363 = vst [vmem:[#allocation3 + $0x8] sm:$0xc] %v2362_v39  ;;  %v2368_v36 = vpack.c.bf16 %v2362_v39, %v2362_v39 }
 0x74d   :  { %v2402_v37 = vrot.slane %v2368_v36, 1 }
 0x74f   :  { %2597 = vmatmul.mubr.bf16.vlgmr.msra.gmra.mrb[28].mxu1 %v2402_v37  ;;  %2638 = vmatmul.mubr.bf16.vlgmr.msra.gmra.mrb[32].mxu0 %v2402_v37 }
 0x750   :  { %2891 = vmatpush1.bf16.msra.mxu1 %v4182_v44  ;;  %2932 = vmatpush1.bf16.msra.mxu0 %v4184_v45 }
 0x751   :  { %2892 = vmatprep.subr.bf16.mxu1 %v4190_v46  ;;  %2933 = vmatprep.subr.bf16.mxu0 %v4192_v47 }
 0x752   :  { %2922 = vmatprep.mubr.bf16.mxu1 %v3852_v38  ;;  %2963 = vmatprep.mubr.bf16.mxu0 %v3852_v38 }
 0x754   :  { %2893 = vmatpush1.bf16.msra.mxu1 %v4194_v50  ;;  %2934 = vmatpush1.bf16.msra.mxu0 %v4196_v17  ;;  %v2364_v50 = vld [vmem:[#allocation2 + $0x20] sm:$0x30] }
 0x755   :  { %2894 = vmatprep.subr.bf16.mxu1 %v4202_v18  ;;  %2935 = vmatprep.subr.bf16.mxu0 %v4204_v19 }
 0x758   :  { %2895 = vmatpush1.bf16.msra.mxu1 %v4206_v20  ;;  %2936 = vmatpush1.bf16.msra.mxu0 %v4208_v21  ;;  %v2365_v21 = vld [vmem:[#allocation2 + $0x28] sm:$0x30] }
 0x759   :  { %2896 = vmatprep.subr.bf16.mxu1 %v4214_v22  ;;  %2937 = vmatprep.subr.bf16.mxu0 %v4216_v23 }
 0x75c   :  { %2897 = vmatpush1.bf16.msra.mxu1 %v4218_v24  ;;  %2938 = vmatpush1.bf16.msra.mxu0 %v4220_v25 }
 0x75d   :  { %2898 = vmatprep.subr.bf16.mxu1 %v4226_v26  ;;  %2939 = vmatprep.subr.bf16.mxu0 %v4228_v29 }
 0x760   :  { %2899 = vmatpush1.bf16.msra.mxu1 %v4230_v30  ;;  %2940 = vmatpush1.bf16.msra.mxu0 %v4232_v27  ;;  %v2366_v30 = vld [vmem:[#allocation2 + $0x30] sm:$0x30] }
 0x761   :  { %2900 = vmatprep.subr.bf16.mxu1 %v4236_v28  ;;  %2941 = vmatprep.subr.bf16.mxu0 %v4238_v48  ;;  %v2367_v48 = vld [vmem:[#allocation2 + $0x38] sm:$0x30] }
 0x764   :  { %2901 = vmatpush1.bf16.msra.mxu1 %v4242_v49  ;;  %2942 = vmatpush1.bf16.msra.mxu0 %v4244_v51 }
 0x765   :  { %2902 = vmatprep.subr.bf16.mxu1 %v4248_v52  ;;  %2943 = vmatprep.subr.bf16.mxu0 %v4250_v53 }
 0x768   :  { %2903 = vmatpush1.bf16.msra.mxu1 %v4254_v54  ;;  %2944 = vmatpush1.bf16.msra.mxu0 %v4256_v55 }
 0x769   :  { %2904 = vmatprep.subr.bf16.mxu1 %v4260_v56  ;;  %2945 = vmatprep.subr.bf16.mxu0 %v4262_v57 }
 0x76c   :  { %2905 = vmatpush1.bf16.msra.mxu1 %v4266_v58  ;;  %2946 = vmatpush1.bf16.msra.mxu0 %v4268_v59  ;;  %v2682_v59 = vrot.slane %v4353_v32, 6 }
 0x76d   :  { %3490 = vmatprep.subr.bf16.mxu1 %v3850_v0 }
 0x822   :  { %v2598_v38 = vpop.f32.mrb[28].mxu1  ;;  %v2639_v44 = vpop.f32.mrb[32].mxu0 }
 0x823   :  { %v2650_v45 = vrot.slane %v2598_v38, 4  ;;  %v2600_v46 = vpop.f32.mrb[29].mxu1  ;;  %v2641_v47 = vpop.f32.mrb[33].mxu0  ;;  %v2652_v29 = vrot.slane %v2639_v44, 4 }
 0x824   :  { %v2651_v17 = vrot.slane %v2600_v46, 4  ;;  %v2602_v18 = vpop.f32.mrb[30].mxu1  ;;  %v2643_v19 = vpop.f32.mrb[34].mxu0  ;;  %v2653_v27 = vrot.slane %v2641_v47, 4 }
 0x825   :  { %v2658_v20 = vadd.f32 %v2650_v45, %v2364_v50  ;;  %v2603_v22 = vpop.f32.mrb[31].mxu1  ;;  %v2644_v23 = vpop.f32.mrb[35].mxu0  ;;  %v2660_v28 = vadd.f32 %v2652_v29, %v2366_v30  ;;  %v2693_v50 = vld [vmem:[#allocation2 + $0x38] sm:$0xc0] }
 0x826   :  { %v2659_v24 = vadd.f32 %v2651_v17, %v2365_v21  ;;  %v2661_v49 = vadd.f32 %v2653_v27, %v2367_v48 }
 0x827   :  { %v3426_v25 = vmul.f32 -1.442695, %v2658_v20  ;;  %v3428_v51 = vmul.f32 -1.442695, %v2660_v28 }
 0x828   :  { %v3427_v26 = vmul.f32 -1.442695, %v2659_v24 }
 0x829   :  { %3766 = vpow2.f32 %v3426_v25 }
 0x82a   :  { %3768 = vpow2.f32 %v3427_v26 }
 0x82b   :  { %3770 = vtanh.f32 %v2661_v49 }
 0x82c   :  { %3772 = vpow2.f32 %v3428_v51 }
 0x833   :  { %v3767_v52 = vpop.eup %3766 }
 0x834   :  { %v2671_v53 = vadd.f32 1.0, %v3767_v52  ;;  %v3769_v54 = vpop.eup %3768 }
 0x835   :  { %v2672_v55 = vadd.f32 1.0, %v3769_v54  ;;  %v3771_v56 = vpop.eup %3770 }
 0x836   :  { %3774 = vrcp.f32 %v2671_v53  ;;  %v3773_v57 = vpop.eup %3772  ;;  %v3018_v53 = vld [vmem:[#allocation3] sm:$0xff] }
 0x837   :  { %3776 = vrcp.f32 %v2672_v55  ;;  %v2673_v41 = vadd.f32 1.0, %v3773_v57 }
 0x839   :  { %3778 = vrcp.f32 %v2673_v41 }
 0x840   :  { %v3775_v58 = vpop.eup %3774 }
 0x841   :  { %v2685_v10 = vmul.f32 %v3775_v58, %v3771_v56  ;;  %v3777_v40 = vpop.eup %3776  ;;  %v3464_v56 = vld [vmem:[%s4451_s9] ss:$0 sm:$0xff] }
 0x842   :  { %v2684_v60 = vmul.f32 %v3777_v40, %v2682_v59 }
 0x843   :  { %v3779_v62 = vpop.eup %3778 }
 0x844   :  { %v4390_v61 = vadd.f32 %v2685_v10, %v2684_v60 }
 0x846   :  { %3780 = vtanh.f32 %v4390_v61  ;;  %v3008_v26 = vrot.slane %v4390_v61, 6 }
 0x850   :  { %v3781_v63 = vpop.eup %3780 }
 0x851   :  { %v2688_v42 = vmul.f32 %v3781_v63, %v3779_v62 }
 0x853   :  { %2689 = vst [vmem:[#allocation3 + $0x8] sm:$0x30] %v2688_v42  ;;  %v2694_v43 = vpack.c.bf16 %v2688_v42, %v2688_v42 }
 0x855   :  { %v2728_v1 = vrot.slane %v2694_v43, 2 }
 0x857   :  { %2923 = vmatmul.mubr.bf16.vlgmr.msra.gmra.mrb[32].mxu1 %v2728_v1  ;;  %2964 = vmatmul.mubr.bf16.vlgmr.msra.gmra.mrb[36].mxu0 %v2728_v1 }
 0x858   :  { %3506 = vmatprep.mubr.msk.bf16.mxu1 %vm3851_vm0, %v3850_v0  ;;  %3491 = vmatpush3.bf16.msra.mxu1 %v3662_v2 }
 0x859   :  { %3492 = vmatprep.subr.bf16.mxu1 %v3850_v0 }
 0x85c   :  { %3493 = vmatpush3.bf16.msra.mxu1 %v3663_v4 }
 0x85d   :  { %3494 = vmatprep.subr.bf16.mxu1 %v3850_v0 }
 0x860   :  { %3495 = vmatpush3.bf16.msra.mxu1 %v3664_v5 }
 0x861   :  { %3496 = vmatprep.subr.bf16.mxu1 %v3850_v0 }
 0x864   :  { %3497 = vmatpush3.bf16.msra.mxu1 %v3665_v6 }
 0x865   :  { %3498 = vmatprep.subr.bf16.mxu1 %v3850_v0 }
 0x868   :  { %3499 = vmatpush3.bf16.msra.mxu1 %v3666_v7 }
 0x869   :  { %3500 = vmatprep.subr.bf16.mxu1 %v3850_v0 }
 0x86c   :  { %3501 = vmatpush3.bf16.msra.mxu1 %v3667_v8 }
 0x86d   :  { %3502 = vmatprep.subr.bf16.mxu1 %v3850_v0 }
 0x870   :  { %3503 = vmatpush3.bf16.msra.mxu1 %v3668_v35 }
 0x871   :  { %3504 = vmatprep.subr.bf16.mxu1 %v3850_v0  ;;  %v2692_v0 = vld [vmem:[#allocation2 + $0x30] sm:$0xc0] }
 0x874   :  { %3505 = vmatpush3.bf16.msra.mxu1 %v3669_v9 }
 0x92a   :  { %v2924_v11 = vpop.f32.mrb[32].mxu1  ;;  %v2965_v12 = vpop.f32.mrb[36].mxu0 }
 0x92b   :  { %v2976_v13 = vrot.slane %v2924_v11, 2  ;;  %v2926_v14 = vpop.f32.mrb[33].mxu1  ;;  %v2967_v3 = vpop.f32.mrb[37].mxu0  ;;  %v2978_v45 = vrot.slane %v2965_v12, 2 }
 0x92c   :  { %v2977_v16 = vrot.slane %v2926_v14, 2  ;;  %v2928_v31 = vpop.f32.mrb[34].mxu1  ;;  %v2969_v32 = vpop.f32.mrb[38].mxu0  ;;  %v2979_v46 = vrot.slane %v2967_v3, 2 }
 0x92d   :  { %v2984_v33 = vadd.f32 %v2976_v13, %v2690_v15  ;;  %v2929_v39 = vpop.f32.mrb[35].mxu1  ;;  %v2970_v36 = vpop.f32.mrb[39].mxu0  ;;  %v2986_v47 = vadd.f32 %v2978_v45, %v2692_v0 }
 0x92e   :  { %v2985_v37 = vadd.f32 %v2977_v16, %v2691_v34  ;;  %v2987_v17 = vadd.f32 %v2979_v46, %v2693_v50 }
 0x92f   :  { %v3461_v38 = vmul.f32 -1.442695, %v2984_v33  ;;  %v3463_v18 = vmul.f32 -1.442695, %v2986_v47 }
 0x930   :  { %v3462_v44 = vmul.f32 -1.442695, %v2985_v37 }
 0x931   :  { %3782 = vpow2.f32 %v3461_v38 }
 0x932   :  { %3784 = vpow2.f32 %v3462_v44 }
 0x933   :  { %3786 = vtanh.f32 %v2987_v17 }
 0x934   :  { %3788 = vpow2.f32 %v3463_v18 }
 0x93b   :  { %v3783_v19 = vpop.eup %3782 }
 0x93c   :  { %v2997_v20 = vadd.f32 1.0, %v3783_v19  ;;  %v3785_v21 = vpop.eup %3784 }
 0x93d   :  { %v2998_v22 = vadd.f32 1.0, %v3785_v21  ;;  %v3787_v23 = vpop.eup %3786 }
 0x93e   :  { %3790 = vrcp.f32 %v2997_v20  ;;  %v3789_v24 = vpop.eup %3788 }
 0x93f   :  { %3792 = vrcp.f32 %v2998_v22  ;;  %v2999_v27 = vadd.f32 1.0, %v3789_v24 }
 0x941   :  { %3794 = vrcp.f32 %v2999_v27 }
 0x948   :  { %v3791_v25 = vpop.eup %3790 }
 0x949   :  { %v3011_v29 = vmul.f32 %v3791_v25, %v3787_v23  ;;  %v3793_v30 = vpop.eup %3792 }
 0x94a   :  { %v3010_v28 = vmul.f32 %v3793_v30, %v3008_v26 }
 0x94b   :  { %v3795_v49 = vpop.eup %3794 }
 0x94c   :  { %v3012_v48 = vadd.f32 %v3011_v29, %v3010_v28 }
 0x94e   :  { %3796 = vtanh.f32 %v3012_v48  ;;  %3017 = vst [vmem:[%s4454_s12 - $0x6] sm:$0xc0] %v3012_v48 }
 0x958   :  { %v3797_v51 = vpop.eup %3796 }
 0x959   :  { %v3014_v52 = vmul.f32 %v3797_v51, %v3795_v49 }
 0x95b   :  { %3015 = vst [vmem:[#allocation3 + $0x8] sm:$0xc0] %v3014_v52  ;;  %3016 = vst [vmem:[%s4453_s11 - $0x6] sm:$0xc0] %v3014_v52 }
 0x962   :  { %v3019_v54 = vld [vmem:[#allocation3 + $0x8] sm:$0xff] }
 0x963   :  { %v3020_v55 = vpack.c.bf16 %v3019_v54, %v3018_v53 }
 0x965   :  { %3507 = vmatmul.mubr.bf16.vlgmr.msra.gmra.mrb[36].mxu1 %v3020_v55 }
 0xa38   :  { %v3126_v57 = vpop.f32.mrb[36].mxu1 }
 0xa39   :  { %v3127_v58 = vadd.f32 %v3464_v56, %v3126_v57  ;;  %v3508_v59 = vpop.f32.mrb[37].mxu1 }
 0xa3a   :  { %v3129_v10 = vpop.f32.mrb[38].mxu1 }
 0xa3b   :  { %3133 = vst [vmem:[%s4452_s10] sm:$0xff] %v3127_v58  ;;  %v3130_v40 = vadd.f32 %v3464_v56, %v3129_v10  ;;  %v3509_v41 = vpop.f32.mrb[39].mxu1 }
 0xa3d   :  { %3134 = vst [vmem:[%s4452_s10 + $0x8] sm:$0xff] %v3130_v40 }
 0xa3e   :  { %3147 = vsyncpa [#allocation5], 1 }
 0xa3f   :  { %3148 = vsyncpa [#allocation7], 1 }

</bundles_post_ra>
